<compile_context>
chip_gen: v7x
topology: tpu7x:2x2x1
jax: 0.10.0
libtpu: 0.0.40
codegen_flags: <defaults>
</compile_context>

<pallas_src>
import jax
import jax.numpy as jnp
from jax.experimental import pallas as pl
from jax.experimental.pallas import tpu as pltpu


# --------------------------------------------------------------------------------------
# Pallas kernel: TB timesteps of one DCGRU cell per grid step.  grid = (batch, time-block)
# --------------------------------------------------------------------------------------
def make_dcgru_kernel(N, H, K, TB):
    def kernel(xg_ref, xc_ref, h0_ref, s_ref, wg_ref, wu_ref, out_ref, state_ref):
        # New batch element -> (re)load its initial hidden state.
        @pl.when(pl.program_id(1) == 0)
        def _init():
            state_ref[...] = h0_ref[...]

        s_cat = s_ref[...]          # [K*N, N]   effective supports, K folded along rows
        wg = wg_ref[...]            # [K, H, 2H] gate weight pool (h-rows only)
        wu = wu_ref[...]            # [K, H, H]  candidate weight pool (h-rows only)
        h = state_ref[...]          # [N, H]     recurrent hidden state

        def gconv_h(h_in, w_pool):
            # (1) all K supports in ONE MXU dot: g[k*N+n, c] = sum_m S_k[n, m] h_in[m, c]
            g = jnp.dot(s_cat, h_in, preferred_element_type=jnp.float32)       # [K*N, H]
            # (2) weight-pool contraction as K small MXU matmuls (static loop).
            acc = jnp.dot(g[0:N, :], w_pool[0], preferred_element_type=jnp.float32)
            for k in range(1, K):
                acc = acc + jnp.dot(g[k * N:(k + 1) * N, :], w_pool[k],
                                    preferred_element_type=jnp.float32)        # [N, O]
            return acc

        # Time block: TB sequential GRU steps per grid iteration.
        for i in range(TB):
            # fused z|r gate (2H wide); x-contribution + bias precomputed outside.
            zr = jax.nn.sigmoid(xg_ref[i] + gconv_h(h, wg))                    # [N, 2H]
            z = zr[:, :H]
            r = zr[:, H:]
            hc = jnp.tanh(xc_ref[i] + gconv_h(z * h, wu))                      # [N, H]
            h = r * h + (1.0 - r) * hc
            out_ref[i] = h                                                     # full-row store

        state_ref[...] = h

    return kernel


def run_dcgru_layer(xg, xc, h0, s_cat, wg_h, wu_h):
    """xg: [B,T,N,2H]  xc: [B,T,N,H]  h0: [B,N,H]  s_cat: [K*N,N]
       wg_h: [K,H,2H]  wu_h: [K,H,H]  ->  hidden sequence [B,T,N,H]."""
    B, T, N, twoH = xg.shape
    H = twoH // 2
    K = s_cat.shape[0] // N
    TB = 4 if T % 4 == 0 else (2 if T % 2 == 0 else 1)
    kernel = make_dcgru_kernel(N, H, K, TB)

    # advisory cost estimate so XLA overlaps the hoisted projection with the kernel
    per_step = (2 * (2 * K * N * N * H)          # two support matmuls (gate + candidate)
                + 2 * K * N * H * 2 * H          # gate weight-pool matmuls
                + 2 * K * N * H * H              # candidate weight-pool matmuls
                + 12 * N * H)                    # GRU elementwise
    flops = int(B * T * per_step)
    trans = int(B * T * N * 3 * H)
    bytes_acc = int(4 * (xg.size + xc.size + B * T * N * H + h0.size
                         + s_cat.size + wg_h.size + wu_h.size))

    return pl.pallas_call(
        kernel,
        out_shape=jax.ShapeDtypeStruct((B, T, N, H), jnp.float32),
        grid=(B, T // TB),
        in_specs=[
            pl.BlockSpec((None, TB, N, 2 * H), lambda b, t: (b, t, 0, 0)),  # xg (hoisted)
            pl.BlockSpec((None, TB, N, H), lambda b, t: (b, t, 0, 0)),      # xc (hoisted)
            pl.BlockSpec((None, N, H), lambda b, t: (b, 0, 0)),             # init hidden
            pl.BlockSpec((K * N, N), lambda b, t: (0, 0)),                  # supports (K folded)
            pl.BlockSpec((K, H, 2 * H), lambda b, t: (0, 0, 0)),            # gate pool (h rows)
            pl.BlockSpec((K, H, H), lambda b, t: (0, 0, 0)),                # cand pool (h rows)
        ],
        out_specs=pl.BlockSpec((None, TB, N, H), lambda b, t: (b, t, 0, 0)),
        scratch_shapes=[pltpu.VMEM((N, H), jnp.float32)],                   # recurrent state
        compiler_params=pltpu.CompilerParams(
            dimension_semantics=("parallel", "arbitrary")),
        cost_estimate=pl.CostEstimate(flops=flops, transcendentals=trans,
                                      bytes_accessed=bytes_acc),
    )(xg, xc, h0, s_cat, wg_h, wu_h)


# --------------------------------------------------------------------------------------
# JAX glue (time-invariant / recurrence-independent work)
# --------------------------------------------------------------------------------------
def diffusion_supports(supports, order):
    """supports: [S, N, N] -> [K, N, N] with K = S*order + 1, matching the gcn concat
       order [I, A1, A1^2, ..., A1^order, A2, ..., A2^order]."""
    S, N, _ = supports.shape
    mats = [jnp.eye(N, dtype=supports.dtype)]
    for s in range(S):
        a = supports[s]
        p = a
        mats.append(p)
        for _ in range(2, order + 1):
            p = a @ p
            mats.append(p)
    return jnp.stack(mats, axis=0)


def init_params(key, num_layers, dim_in, dim_out, num_supports, order):
    K = num_supports * order + 1
    params = []
    for i in range(num_layers):
        cin = dim_in if i == 0 else dim_out
        key, k1, k2, k3, k4 = jax.random.split(key, 5)
        params.append(dict(
            gate_w=0.1 * jax.random.normal(k1, (K, cin + dim_out, 2 * dim_out), jnp.float32),
            gate_b=0.1 * jax.random.normal(k2, (2 * dim_out,), jnp.float32),
            update_w=0.1 * jax.random.normal(k3, (K, cin + dim_out, dim_out), jnp.float32),
            update_b=0.1 * jax.random.normal(k4, (dim_out,), jnp.float32),
        ))
    return params


def dcrnn_forward(x, init_state, supports, params, hidden_dim, order):
    """x: [B, T, N, C_in], init_state: [L, B, N, H], supports: [S, N, N]."""
    hp = jax.lax.Precision.HIGHEST
    B, T, N, _ = x.shape
    eff = diffusion_supports(supports, order)                 # [K, N, N]
    K = eff.shape[0]
    s_cat = eff.reshape(K * N, N)

    current = x
    output_hidden = []
    for i, p in enumerate(params):
        cin = current.shape[-1]
        gw, gb, uw, ub = p['gate_w'], p['gate_b'], p['update_w'], p['update_b']

        # ---- hoisted input projection (h-independent) for the whole sequence ----
        Gx = jnp.einsum('knm,btmc->btknc', eff, current, precision=hp)              # [B,T,K,N,cin]
        XG = jnp.einsum('btknc,kco->btno', Gx, gw[:, :cin, :], precision=hp) + gb   # [B,T,N,2H]
        XC = jnp.einsum('btknc,kco->btno', Gx, uw[:, :cin, :], precision=hp) + ub   # [B,T,N,H]

        # ---- recurrent (h-dependent) weight pools, kept resident in VMEM ----
        wg_h = gw[:, cin:, :]                                                       # [K, H, 2H]
        wu_h = uw[:, cin:, :]                                                       # [K, H, H]

        current = run_dcgru_layer(XG, XC, init_state[i], s_cat, wg_h, wu_h)         # [B,T,N,H]
        output_hidden.append(current[:, -1])
    return current, output_hidden


# --------------------------------------------------------------------------------------
# Pure-JAX mirror of the PyTorch forward (correctness reference)
# --------------------------------------------------------------------------------------
def reference_forward(x, init_state, supports, params, hidden_dim, order):
    hp = jax.lax.Precision.HIGHEST
    B, T, N, _ = x.shape
    H = hidden_dim
    eff = diffusion_supports(supports, order)
    current = x
    output_hidden = []
    for li, p in enumerate(params):
        state = init_state[li]
        states = []
        for t in range(T):
            xt = current[:, t]
            u = jnp.concatenate([xt, state], axis=-1)
            gu = jnp.einsum('knm,bmc->bnkc', eff, u, precision=hp)
            zr = jax.nn.sigmoid(
                jnp.einsum('bnkc,kco->bno', gu, p['gate_w'], precision=hp) + p['gate_b'])
            z, r = zr[..., :H], zr[..., H:]
            cand = jnp.concatenate([xt, z * state], axis=-1)
            gc = jnp.einsum('knm,bmc->bnkc', eff, cand, precision=hp)
            hc = jnp.tanh(
                jnp.einsum('bnkc,kco->bno', gc, p['update_w'], precision=hp) + p['update_b'])
            state = r * state + (1.0 - r) * hc
            states.append(state)
        current = jnp.stack(states, axis=1)
        output_hidden.append(state)
    return current, output_hidden


if __name__ == "__main__":
    # small shapes: batch=2, seq=8, nodes=16, input_dim=2, hidden=32, order=2,
    # 2 supports (fwd/bwd random walk), 2 layers
    B, T, N = 2, 8, 16
    dim_in, hidden_dim, order, num_supports, num_layers = 2, 32, 2, 2, 2

    key = jax.random.PRNGKey(0)
    kx, ka, kp = jax.random.split(key, 3)
    x = jax.random.normal(kx, (B, T, N, dim_in), jnp.float32)

    adj = jax.random.uniform(ka, (N, N), jnp.float32) + 1e-3
    a_fwd = adj / jnp.sum(adj, axis=1, keepdims=True)
    a_bwd = adj.T / jnp.sum(adj.T, axis=1, keepdims=True)
    supports = jnp.stack([a_fwd, a_bwd], axis=0)                           # [S, N, N]

    params = init_params(kp, num_layers, dim_in, hidden_dim, num_supports, order)
    init_state = jnp.zeros((num_layers, B, N, hidden_dim), jnp.float32)    # == init_hidden(B)

    out, hidden = dcrnn_forward(x, init_state, supports, params, hidden_dim, order)
    out = jax.block_until_ready(out)

    ref_out, ref_hidden = reference_forward(x, init_state, supports, params, hidden_dim, order)

    assert out.shape == (B, T, N, hidden_dim)
    assert len(hidden) == num_layers and hidden[0].shape == (B, N, hidden_dim)
    assert jnp.allclose(out, ref_out, rtol=2e-2, atol=2e-2), \
        f"max diff {float(jnp.max(jnp.abs(out - ref_out)))}"
    for h, rh in zip(hidden, ref_hidden):
        assert jnp.allclose(h, rh, rtol=2e-2, atol=2e-2)

    print("KERNEL_OK")
</pallas_src>

<mosaic_0001>
module attributes {stable_mosaic.version = 11 : i64} {
  func.func @kernel(%arg0: i32, %arg1: i32, %arg2: memref<1x4x16x64xf32, #tpu.memory_space<vmem>>, %arg3: memref<1x4x16x32xf32, #tpu.memory_space<vmem>>, %arg4: memref<1x16x32xf32, #tpu.memory_space<vmem>>, %arg5: memref<80x16xf32, #tpu.memory_space<vmem>>, %arg6: memref<5x32x64xf32, #tpu.memory_space<vmem>>, %arg7: memref<5x32x32xf32, #tpu.memory_space<vmem>>, %arg8: memref<1x4x16x32xf32, #tpu.memory_space<vmem>>, %arg9: memref<16x32xf32, #tpu.memory_space<vmem>>) attributes {dimension_semantics = [#tpu.dimension_semantics<parallel>, #tpu.dimension_semantics<arbitrary>], iteration_bounds = array<i64: 2, 2>, scalar_prefetch = 0 : i64, scratch_operands = 1 : i64, tpu.core_type = #tpu.core_type<tc>, window_params = [{transform_indices = @transform_0, window_bounds = array<i64: 1, 4, 16, 64>}, {transform_indices = @transform_1, window_bounds = array<i64: 1, 4, 16, 32>}, {transform_indices = @transform_2, window_bounds = array<i64: 1, 16, 32>}, {pipeline_mode = #tpu.pipeline_mode<synchronous>, transform_indices = @transform_3, window_bounds = array<i64: 80, 16>}, {pipeline_mode = #tpu.pipeline_mode<synchronous>, transform_indices = @transform_4, window_bounds = array<i64: 5, 32, 64>}, {pipeline_mode = #tpu.pipeline_mode<synchronous>, transform_indices = @transform_5, window_bounds = array<i64: 5, 32, 32>}, {transform_indices = @transform_6, window_bounds = array<i64: 1, 4, 16, 32>}]} {
    %c0_i32 = arith.constant 0 : i32
    %0 = arith.cmpi eq, %arg1, %c0_i32 : i32
    %1 = arith.extui %0 : i1 to i32
    %c0_i32_0 = arith.constant 0 : i32
    %2 = arith.cmpi ne, %1, %c0_i32_0 : i32
    scf.if %2 {
      %c0_112 = arith.constant 0 : index
      %c0_113 = arith.constant 0 : index
      %c0_114 = arith.constant 0 : index
      %300 = vector.load %arg4[%c0_112, %c0_113, %c0_114] : memref<1x16x32xf32, #tpu.memory_space<vmem>>, vector<1x16x32xf32>
      %301 = vector.shape_cast %300 : vector<1x16x32xf32> to vector<16x32xf32>
      %c0_115 = arith.constant 0 : index
      %c0_116 = arith.constant 0 : index
      %302 = vector.load %arg9[%c0_115, %c0_116] : memref<16x32xf32, #tpu.memory_space<vmem>>, vector<16x32xf32>
      tpu.vector_store %arg9[%c0_115, %c0_116], %301 {strides = array<i32>} : memref<16x32xf32, #tpu.memory_space<vmem>>, vector<16x32xf32>,
    } else {
    }
    %c0 = arith.constant 0 : index
    %c0_1 = arith.constant 0 : index
    %3 = vector.load %arg5[%c0, %c0_1] : memref<80x16xf32, #tpu.memory_space<vmem>>, vector<80x16xf32>
    %c0_2 = arith.constant 0 : index
    %c0_3 = arith.constant 0 : index
    %c0_4 = arith.constant 0 : index
    %4 = vector.load %arg6[%c0_2, %c0_3, %c0_4] : memref<5x32x64xf32, #tpu.memory_space<vmem>>, vector<5x32x64xf32>
    %c0_5 = arith.constant 0 : index
    %c0_6 = arith.constant 0 : index
    %c0_7 = arith.constant 0 : index
    %5 = vector.load %arg7[%c0_5, %c0_6, %c0_7] : memref<5x32x32xf32, #tpu.memory_space<vmem>>, vector<5x32x32xf32>
    %c0_8 = arith.constant 0 : index
    %c0_9 = arith.constant 0 : index
    %6 = vector.load %arg9[%c0_8, %c0_9] : memref<16x32xf32, #tpu.memory_space<vmem>>, vector<16x32xf32>
    %c0_10 = arith.constant 0 : index
    %c0_11 = arith.constant 0 : index
    %c0_12 = arith.constant 0 : index
    %c0_13 = arith.constant 0 : index
    %7 = vector.load %arg2[%c0_10, %c0_11, %c0_12, %c0_13] : memref<1x4x16x64xf32, #tpu.memory_space<vmem>>, vector<1x1x16x64xf32>
    %8 = vector.shape_cast %7 : vector<1x1x16x64xf32> to vector<16x64xf32>
    %cst = arith.constant dense<0.000000e+00> : vector<80x32xf32>
    %9 = tpu.matmul %3, %6, %cst {dimension_numbers = #tpu.dot_dimension_numbers<[1], [0], [0], [1], [0, 0, 1, 1], [], []>} : vector<80x16xf32>, vector<16x32xf32>, vector<80x32xf32> -> vector<80x32xf32>
    %10 = vector.extract_strided_slice %9 {offsets = [0, 0], sizes = [16, 32], strides = [1, 1]} : vector<80x32xf32> to vector<16x32xf32>
    %11 = vector.extract_strided_slice %4 {offsets = [0, 0, 0], sizes = [1, 32, 64], strides = [1, 1, 1]} : vector<5x32x64xf32> to vector<1x32x64xf32>
    %12 = vector.shape_cast %11 : vector<1x32x64xf32> to vector<32x64xf32>
    %cst_14 = arith.constant dense<0.000000e+00> : vector<16x64xf32>
    %13 = tpu.matmul %10, %12, %cst_14 {dimension_numbers = #tpu.dot_dimension_numbers<[1], [0], [0], [1], [0, 0, 1, 1], [], []>} : vector<16x32xf32>, vector<32x64xf32>, vector<16x64xf32> -> vector<16x64xf32>
    %14 = vector.extract_strided_slice %9 {offsets = [16, 0], sizes = [16, 32], strides = [1, 1]} : vector<80x32xf32> to vector<16x32xf32>
    %15 = vector.extract_strided_slice %4 {offsets = [1, 0, 0], sizes = [1, 32, 64], strides = [1, 1, 1]} : vector<5x32x64xf32> to vector<1x32x64xf32>
    %16 = vector.shape_cast %15 : vector<1x32x64xf32> to vector<32x64xf32>
    %cst_15 = arith.constant dense<0.000000e+00> : vector<16x64xf32>
    %17 = tpu.matmul %14, %16, %cst_15 {dimension_numbers = #tpu.dot_dimension_numbers<[1], [0], [0], [1], [0, 0, 1, 1], [], []>} : vector<16x32xf32>, vector<32x64xf32>, vector<16x64xf32> -> vector<16x64xf32>
    %18 = arith.addf %13, %17 : vector<16x64xf32>
    %19 = vector.extract_strided_slice %9 {offsets = [32, 0], sizes = [16, 32], strides = [1, 1]} : vector<80x32xf32> to vector<16x32xf32>
    %20 = vector.extract_strided_slice %4 {offsets = [2, 0, 0], sizes = [1, 32, 64], strides = [1, 1, 1]} : vector<5x32x64xf32> to vector<1x32x64xf32>
    %21 = vector.shape_cast %20 : vector<1x32x64xf32> to vector<32x64xf32>
    %cst_16 = arith.constant dense<0.000000e+00> : vector<16x64xf32>
    %22 = tpu.matmul %19, %21, %cst_16 {dimension_numbers = #tpu.dot_dimension_numbers<[1], [0], [0], [1], [0, 0, 1, 1], [], []>} : vector<16x32xf32>, vector<32x64xf32>, vector<16x64xf32> -> vector<16x64xf32>
    %23 = arith.addf %18, %22 : vector<16x64xf32>
    %24 = vector.extract_strided_slice %9 {offsets = [48, 0], sizes = [16, 32], strides = [1, 1]} : vector<80x32xf32> to vector<16x32xf32>
    %25 = vector.extract_strided_slice %4 {offsets = [3, 0, 0], sizes = [1, 32, 64], strides = [1, 1, 1]} : vector<5x32x64xf32> to vector<1x32x64xf32>
    %26 = vector.shape_cast %25 : vector<1x32x64xf32> to vector<32x64xf32>
    %cst_17 = arith.constant dense<0.000000e+00> : vector<16x64xf32>
    %27 = tpu.matmul %24, %26, %cst_17 {dimension_numbers = #tpu.dot_dimension_numbers<[1], [0], [0], [1], [0, 0, 1, 1], [], []>} : vector<16x32xf32>, vector<32x64xf32>, vector<16x64xf32> -> vector<16x64xf32>
    %28 = arith.addf %23, %27 : vector<16x64xf32>
    %29 = vector.extract_strided_slice %9 {offsets = [64, 0], sizes = [16, 32], strides = [1, 1]} : vector<80x32xf32> to vector<16x32xf32>
    %30 = vector.extract_strided_slice %4 {offsets = [4, 0, 0], sizes = [1, 32, 64], strides = [1, 1, 1]} : vector<5x32x64xf32> to vector<1x32x64xf32>
    %31 = vector.shape_cast %30 : vector<1x32x64xf32> to vector<32x64xf32>
    %cst_18 = arith.constant dense<0.000000e+00> : vector<16x64xf32>
    %32 = tpu.matmul %29, %31, %cst_18 {dimension_numbers = #tpu.dot_dimension_numbers<[1], [0], [0], [1], [0, 0, 1, 1], [], []>} : vector<16x32xf32>, vector<32x64xf32>, vector<16x64xf32> -> vector<16x64xf32>
    %33 = arith.addf %28, %32 : vector<16x64xf32>
    %34 = arith.addf %8, %33 : vector<16x64xf32>
    %35 = arith.negf %34 : vector<16x64xf32>
    %36 = math.exp %35 : vector<16x64xf32>
    %cst_19 = arith.constant 1.000000e+00 : f32
    %37 = vector.broadcast %cst_19 : f32 to vector<16x64xf32>
    %38 = arith.addf %37, %36 : vector<16x64xf32>
    %39 = arith.divf %37, %38 : vector<16x64xf32>
    %40 = vector.extract_strided_slice %39 {offsets = [0, 0], sizes = [16, 32], strides = [1, 1]} : vector<16x64xf32> to vector<16x32xf32>
    %41 = vector.extract_strided_slice %39 {offsets = [0, 32], sizes = [16, 32], strides = [1, 1]} : vector<16x64xf32> to vector<16x32xf32>
    %c0_20 = arith.constant 0 : index
    %c0_21 = arith.constant 0 : index
    %c0_22 = arith.constant 0 : index
    %c0_23 = arith.constant 0 : index
    %42 = vector.load %arg3[%c0_20, %c0_21, %c0_22, %c0_23] : memref<1x4x16x32xf32, #tpu.memory_space<vmem>>, vector<1x1x16x32xf32>
    %43 = vector.shape_cast %42 : vector<1x1x16x32xf32> to vector<16x32xf32>
    %44 = arith.mulf %40, %6 : vector<16x32xf32>
    %cst_24 = arith.constant dense<0.000000e+00> : vector<80x32xf32>
    %45 = tpu.matmul %3, %44, %cst_24 {dimension_numbers = #tpu.dot_dimension_numbers<[1], [0], [0], [1], [0, 0, 1, 1], [], []>} : vector<80x16xf32>, vector<16x32xf32>, vector<80x32xf32> -> vector<80x32xf32>
    %46 = vector.extract_strided_slice %45 {offsets = [0, 0], sizes = [16, 32], strides = [1, 1]} : vector<80x32xf32> to vector<16x32xf32>
    %47 = vector.extract_strided_slice %5 {offsets = [0, 0, 0], sizes = [1, 32, 32], strides = [1, 1, 1]} : vector<5x32x32xf32> to vector<1x32x32xf32>
    %48 = vector.shape_cast %47 : vector<1x32x32xf32> to vector<32x32xf32>
    %cst_25 = arith.constant dense<0.000000e+00> : vector<16x32xf32>
    %49 = tpu.matmul %46, %48, %cst_25 {dimension_numbers = #tpu.dot_dimension_numbers<[1], [0], [0], [1], [0, 0, 1, 1], [], []>} : vector<16x32xf32>, vector<32x32xf32>, vector<16x32xf32> -> vector<16x32xf32>
    %50 = vector.extract_strided_slice %45 {offsets = [16, 0], sizes = [16, 32], strides = [1, 1]} : vector<80x32xf32> to vector<16x32xf32>
    %51 = vector.extract_strided_slice %5 {offsets = [1, 0, 0], sizes = [1, 32, 32], strides = [1, 1, 1]} : vector<5x32x32xf32> to vector<1x32x32xf32>
    %52 = vector.shape_cast %51 : vector<1x32x32xf32> to vector<32x32xf32>
    %cst_26 = arith.constant dense<0.000000e+00> : vector<16x32xf32>
    %53 = tpu.matmul %50, %52, %cst_26 {dimension_numbers = #tpu.dot_dimension_numbers<[1], [0], [0], [1], [0, 0, 1, 1], [], []>} : vector<16x32xf32>, vector<32x32xf32>, vector<16x32xf32> -> vector<16x32xf32>
    %54 = arith.addf %49, %53 : vector<16x32xf32>
    %55 = vector.extract_strided_slice %45 {offsets = [32, 0], sizes = [16, 32], strides = [1, 1]} : vector<80x32xf32> to vector<16x32xf32>
    %56 = vector.extract_strided_slice %5 {offsets = [2, 0, 0], sizes = [1, 32, 32], strides = [1, 1, 1]} : vector<5x32x32xf32> to vector<1x32x32xf32>
    %57 = vector.shape_cast %56 : vector<1x32x32xf32> to vector<32x32xf32>
    %cst_27 = arith.constant dense<0.000000e+00> : vector<16x32xf32>
    %58 = tpu.matmul %55, %57, %cst_27 {dimension_numbers = #tpu.dot_dimension_numbers<[1], [0], [0], [1], [0, 0, 1, 1], [], []>} : vector<16x32xf32>, vector<32x32xf32>, vector<16x32xf32> -> vector<16x32xf32>
    %59 = arith.addf %54, %58 : vector<16x32xf32>
    %60 = vector.extract_strided_slice %45 {offsets = [48, 0], sizes = [16, 32], strides = [1, 1]} : vector<80x32xf32> to vector<16x32xf32>
    %61 = vector.extract_strided_slice %5 {offsets = [3, 0, 0], sizes = [1, 32, 32], strides = [1, 1, 1]} : vector<5x32x32xf32> to vector<1x32x32xf32>
    %62 = vector.shape_cast %61 : vector<1x32x32xf32> to vector<32x32xf32>
    %cst_28 = arith.constant dense<0.000000e+00> : vector<16x32xf32>
    %63 = tpu.matmul %60, %62, %cst_28 {dimension_numbers = #tpu.dot_dimension_numbers<[1], [0], [0], [1], [0, 0, 1, 1], [], []>} : vector<16x32xf32>, vector<32x32xf32>, vector<16x32xf32> -> vector<16x32xf32>
    %64 = arith.addf %59, %63 : vector<16x32xf32>
    %65 = vector.extract_strided_slice %45 {offsets = [64, 0], sizes = [16, 32], strides = [1, 1]} : vector<80x32xf32> to vector<16x32xf32>
    %66 = vector.extract_strided_slice %5 {offsets = [4, 0, 0], sizes = [1, 32, 32], strides = [1, 1, 1]} : vector<5x32x32xf32> to vector<1x32x32xf32>
    %67 = vector.shape_cast %66 : vector<1x32x32xf32> to vector<32x32xf32>
    %cst_29 = arith.constant dense<0.000000e+00> : vector<16x32xf32>
    %68 = tpu.matmul %65, %67, %cst_29 {dimension_numbers = #tpu.dot_dimension_numbers<[1], [0], [0], [1], [0, 0, 1, 1], [], []>} : vector<16x32xf32>, vector<32x32xf32>, vector<16x32xf32> -> vector<16x32xf32>
    %69 = arith.addf %64, %68 : vector<16x32xf32>
    %70 = arith.addf %43, %69 : vector<16x32xf32>
    %71 = math.tanh %70 : vector<16x32xf32>
    %72 = arith.mulf %41, %6 : vector<16x32xf32>
    %cst_30 = arith.constant 1.000000e+00 : f32
    %73 = vector.broadcast %cst_30 : f32 to vector<16x32xf32>
    %74 = arith.subf %73, %41 : vector<16x32xf32>
    %75 = arith.mulf %74, %71 : vector<16x32xf32>
    %76 = arith.addf %72, %75 : vector<16x32xf32>
    %c0_31 = arith.constant 0 : index
    %c0_32 = arith.constant 0 : index
    %c0_33 = arith.constant 0 : index
    %c0_34 = arith.constant 0 : index
    %77 = vector.load %arg8[%c0_31, %c0_32, %c0_33, %c0_34] : memref<1x4x16x32xf32, #tpu.memory_space<vmem>>, vector<1x1x16x32xf32>
    %78 = vector.shape_cast %77 : vector<1x1x16x32xf32> to vector<16x32xf32>
    %79 = vector.shape_cast %76 : vector<16x32xf32> to vector<1x1x16x32xf32>
    tpu.vector_store %arg8[%c0_31, %c0_32, %c0_33, %c0_34], %79 {strides = array<i32>} : memref<1x4x16x32xf32, #tpu.memory_space<vmem>>, vector<1x1x16x32xf32>,
    %c0_35 = arith.constant 0 : index
    %c1 = arith.constant 1 : index
    %c0_36 = arith.constant 0 : index
    %c0_37 = arith.constant 0 : index
    %80 = vector.load %arg2[%c0_35, %c1, %c0_36, %c0_37] : memref<1x4x16x64xf32, #tpu.memory_space<vmem>>, vector<1x1x16x64xf32>
    %81 = vector.shape_cast %80 : vector<1x1x16x64xf32> to vector<16x64xf32>
    %cst_38 = arith.constant dense<0.000000e+00> : vector<80x32xf32>
    %82 = tpu.matmul %3, %76, %cst_38 {dimension_numbers = #tpu.dot_dimension_numbers<[1], [0], [0], [1], [0, 0, 1, 1], [], []>} : vector<80x16xf32>, vector<16x32xf32>, vector<80x32xf32> -> vector<80x32xf32>
    %83 = vector.extract_strided_slice %82 {offsets = [0, 0], sizes = [16, 32], strides = [1, 1]} : vector<80x32xf32> to vector<16x32xf32>
    %84 = vector.extract_strided_slice %4 {offsets = [0, 0, 0], sizes = [1, 32, 64], strides = [1, 1, 1]} : vector<5x32x64xf32> to vector<1x32x64xf32>
    %85 = vector.shape_cast %84 : vector<1x32x64xf32> to vector<32x64xf32>
    %cst_39 = arith.constant dense<0.000000e+00> : vector<16x64xf32>
    %86 = tpu.matmul %83, %85, %cst_39 {dimension_numbers = #tpu.dot_dimension_numbers<[1], [0], [0], [1], [0, 0, 1, 1], [], []>} : vector<16x32xf32>, vector<32x64xf32>, vector<16x64xf32> -> vector<16x64xf32>
    %87 = vector.extract_strided_slice %82 {offsets = [16, 0], sizes = [16, 32], strides = [1, 1]} : vector<80x32xf32> to vector<16x32xf32>
    %88 = vector.extract_strided_slice %4 {offsets = [1, 0, 0], sizes = [1, 32, 64], strides = [1, 1, 1]} : vector<5x32x64xf32> to vector<1x32x64xf32>
    %89 = vector.shape_cast %88 : vector<1x32x64xf32> to vector<32x64xf32>
    %cst_40 = arith.constant dense<0.000000e+00> : vector<16x64xf32>
    %90 = tpu.matmul %87, %89, %cst_40 {dimension_numbers = #tpu.dot_dimension_numbers<[1], [0], [0], [1], [0, 0, 1, 1], [], []>} : vector<16x32xf32>, vector<32x64xf32>, vector<16x64xf32> -> vector<16x64xf32>
    %91 = arith.addf %86, %90 : vector<16x64xf32>
    %92 = vector.extract_strided_slice %82 {offsets = [32, 0], sizes = [16, 32], strides = [1, 1]} : vector<80x32xf32> to vector<16x32xf32>
    %93 = vector.extract_strided_slice %4 {offsets = [2, 0, 0], sizes = [1, 32, 64], strides = [1, 1, 1]} : vector<5x32x64xf32> to vector<1x32x64xf32>
    %94 = vector.shape_cast %93 : vector<1x32x64xf32> to vector<32x64xf32>
    %cst_41 = arith.constant dense<0.000000e+00> : vector<16x64xf32>
    %95 = tpu.matmul %92, %94, %cst_41 {dimension_numbers = #tpu.dot_dimension_numbers<[1], [0], [0], [1], [0, 0, 1, 1], [], []>} : vector<16x32xf32>, vector<32x64xf32>, vector<16x64xf32> -> vector<16x64xf32>
    %96 = arith.addf %91, %95 : vector<16x64xf32>
    %97 = vector.extract_strided_slice %82 {offsets = [48, 0], sizes = [16, 32], strides = [1, 1]} : vector<80x32xf32> to vector<16x32xf32>
    %98 = vector.extract_strided_slice %4 {offsets = [3, 0, 0], sizes = [1, 32, 64], strides = [1, 1, 1]} : vector<5x32x64xf32> to vector<1x32x64xf32>
    %99 = vector.shape_cast %98 : vector<1x32x64xf32> to vector<32x64xf32>
    %cst_42 = arith.constant dense<0.000000e+00> : vector<16x64xf32>
    %100 = tpu.matmul %97, %99, %cst_42 {dimension_numbers = #tpu.dot_dimension_numbers<[1], [0], [0], [1], [0, 0, 1, 1], [], []>} : vector<16x32xf32>, vector<32x64xf32>, vector<16x64xf32> -> vector<16x64xf32>
    %101 = arith.addf %96, %100 : vector<16x64xf32>
    %102 = vector.extract_strided_slice %82 {offsets = [64, 0], sizes = [16, 32], strides = [1, 1]} : vector<80x32xf32> to vector<16x32xf32>
    %103 = vector.extract_strided_slice %4 {offsets = [4, 0, 0], sizes = [1, 32, 64], strides = [1, 1, 1]} : vector<5x32x64xf32> to vector<1x32x64xf32>
    %104 = vector.shape_cast %103 : vector<1x32x64xf32> to vector<32x64xf32>
    %cst_43 = arith.constant dense<0.000000e+00> : vector<16x64xf32>
    %105 = tpu.matmul %102, %104, %cst_43 {dimension_numbers = #tpu.dot_dimension_numbers<[1], [0], [0], [1], [0, 0, 1, 1], [], []>} : vector<16x32xf32>, vector<32x64xf32>, vector<16x64xf32> -> vector<16x64xf32>
    %106 = arith.addf %101, %105 : vector<16x64xf32>
    %107 = arith.addf %81, %106 : vector<16x64xf32>
    %108 = arith.negf %107 : vector<16x64xf32>
    %109 = math.exp %108 : vector<16x64xf32>
    %cst_44 = arith.constant 1.000000e+00 : f32
    %110 = vector.broadcast %cst_44 : f32 to vector<16x64xf32>
    %111 = arith.addf %110, %109 : vector<16x64xf32>
    %112 = arith.divf %110, %111 : vector<16x64xf32>
    %113 = vector.extract_strided_slice %112 {offsets = [0, 0], sizes = [16, 32], strides = [1, 1]} : vector<16x64xf32> to vector<16x32xf32>
    %114 = vector.extract_strided_slice %112 {offsets = [0, 32], sizes = [16, 32], strides = [1, 1]} : vector<16x64xf32> to vector<16x32xf32>
    %c0_45 = arith.constant 0 : index
    %c1_46 = arith.constant 1 : index
    %c0_47 = arith.constant 0 : index
    %c0_48 = arith.constant 0 : index
    %115 = vector.load %arg3[%c0_45, %c1_46, %c0_47, %c0_48] : memref<1x4x16x32xf32, #tpu.memory_space<vmem>>, vector<1x1x16x32xf32>
    %116 = vector.shape_cast %115 : vector<1x1x16x32xf32> to vector<16x32xf32>
    %117 = arith.mulf %113, %76 : vector<16x32xf32>
    %cst_49 = arith.constant dense<0.000000e+00> : vector<80x32xf32>
    %118 = tpu.matmul %3, %117, %cst_49 {dimension_numbers = #tpu.dot_dimension_numbers<[1], [0], [0], [1], [0, 0, 1, 1], [], []>} : vector<80x16xf32>, vector<16x32xf32>, vector<80x32xf32> -> vector<80x32xf32>
    %119 = vector.extract_strided_slice %118 {offsets = [0, 0], sizes = [16, 32], strides = [1, 1]} : vector<80x32xf32> to vector<16x32xf32>
    %120 = vector.extract_strided_slice %5 {offsets = [0, 0, 0], sizes = [1, 32, 32], strides = [1, 1, 1]} : vector<5x32x32xf32> to vector<1x32x32xf32>
    %121 = vector.shape_cast %120 : vector<1x32x32xf32> to vector<32x32xf32>
    %cst_50 = arith.constant dense<0.000000e+00> : vector<16x32xf32>
    %122 = tpu.matmul %119, %121, %cst_50 {dimension_numbers = #tpu.dot_dimension_numbers<[1], [0], [0], [1], [0, 0, 1, 1], [], []>} : vector<16x32xf32>, vector<32x32xf32>, vector<16x32xf32> -> vector<16x32xf32>
    %123 = vector.extract_strided_slice %118 {offsets = [16, 0], sizes = [16, 32], strides = [1, 1]} : vector<80x32xf32> to vector<16x32xf32>
    %124 = vector.extract_strided_slice %5 {offsets = [1, 0, 0], sizes = [1, 32, 32], strides = [1, 1, 1]} : vector<5x32x32xf32> to vector<1x32x32xf32>
    %125 = vector.shape_cast %124 : vector<1x32x32xf32> to vector<32x32xf32>
    %cst_51 = arith.constant dense<0.000000e+00> : vector<16x32xf32>
    %126 = tpu.matmul %123, %125, %cst_51 {dimension_numbers = #tpu.dot_dimension_numbers<[1], [0], [0], [1], [0, 0, 1, 1], [], []>} : vector<16x32xf32>, vector<32x32xf32>, vector<16x32xf32> -> vector<16x32xf32>
    %127 = arith.addf %122, %126 : vector<16x32xf32>
    %128 = vector.extract_strided_slice %118 {offsets = [32, 0], sizes = [16, 32], strides = [1, 1]} : vector<80x32xf32> to vector<16x32xf32>
    %129 = vector.extract_strided_slice %5 {offsets = [2, 0, 0], sizes = [1, 32, 32], strides = [1, 1, 1]} : vector<5x32x32xf32> to vector<1x32x32xf32>
    %130 = vector.shape_cast %129 : vector<1x32x32xf32> to vector<32x32xf32>
    %cst_52 = arith.constant dense<0.000000e+00> : vector<16x32xf32>
    %131 = tpu.matmul %128, %130, %cst_52 {dimension_numbers = #tpu.dot_dimension_numbers<[1], [0], [0], [1], [0, 0, 1, 1], [], []>} : vector<16x32xf32>, vector<32x32xf32>, vector<16x32xf32> -> vector<16x32xf32>
    %132 = arith.addf %127, %131 : vector<16x32xf32>
    %133 = vector.extract_strided_slice %118 {offsets = [48, 0], sizes = [16, 32], strides = [1, 1]} : vector<80x32xf32> to vector<16x32xf32>
    %134 = vector.extract_strided_slice %5 {offsets = [3, 0, 0], sizes = [1, 32, 32], strides = [1, 1, 1]} : vector<5x32x32xf32> to vector<1x32x32xf32>
    %135 = vector.shape_cast %134 : vector<1x32x32xf32> to vector<32x32xf32>
    %cst_53 = arith.constant dense<0.000000e+00> : vector<16x32xf32>
    %136 = tpu.matmul %133, %135, %cst_53 {dimension_numbers = #tpu.dot_dimension_numbers<[1], [0], [0], [1], [0, 0, 1, 1], [], []>} : vector<16x32xf32>, vector<32x32xf32>, vector<16x32xf32> -> vector<16x32xf32>
    %137 = arith.addf %132, %136 : vector<16x32xf32>
    %138 = vector.extract_strided_slice %118 {offsets = [64, 0], sizes = [16, 32], strides = [1, 1]} : vector<80x32xf32> to vector<16x32xf32>
    %139 = vector.extract_strided_slice %5 {offsets = [4, 0, 0], sizes = [1, 32, 32], strides = [1, 1, 1]} : vector<5x32x32xf32> to vector<1x32x32xf32>
    %140 = vector.shape_cast %139 : vector<1x32x32xf32> to vector<32x32xf32>
    %cst_54 = arith.constant dense<0.000000e+00> : vector<16x32xf32>
    %141 = tpu.matmul %138, %140, %cst_54 {dimension_numbers = #tpu.dot_dimension_numbers<[1], [0], [0], [1], [0, 0, 1, 1], [], []>} : vector<16x32xf32>, vector<32x32xf32>, vector<16x32xf32> -> vector<16x32xf32>
    %142 = arith.addf %137, %141 : vector<16x32xf32>
    %143 = arith.addf %116, %142 : vector<16x32xf32>
    %144 = math.tanh %143 : vector<16x32xf32>
    %145 = arith.mulf %114, %76 : vector<16x32xf32>
    %cst_55 = arith.constant 1.000000e+00 : f32
    %146 = vector.broadcast %cst_55 : f32 to vector<16x32xf32>
    %147 = arith.subf %146, %114 : vector<16x32xf32>
    %148 = arith.mulf %147, %144 : vector<16x32xf32>
    %149 = arith.addf %145, %148 : vector<16x32xf32>
    %c0_56 = arith.constant 0 : index
    %c1_57 = arith.constant 1 : index
    %c0_58 = arith.constant 0 : index
    %c0_59 = arith.constant 0 : index
    %150 = vector.load %arg8[%c0_56, %c1_57, %c0_58, %c0_59] : memref<1x4x16x32xf32, #tpu.memory_space<vmem>>, vector<1x1x16x32xf32>
    %151 = vector.shape_cast %150 : vector<1x1x16x32xf32> to vector<16x32xf32>
    %152 = vector.shape_cast %149 : vector<16x32xf32> to vector<1x1x16x32xf32>
    tpu.vector_store %arg8[%c0_56, %c1_57, %c0_58, %c0_59], %152 {strides = array<i32>} : memref<1x4x16x32xf32, #tpu.memory_space<vmem>>, vector<1x1x16x32xf32>,
    %c0_60 = arith.constant 0 : index
    %c2 = arith.constant 2 : index
    %c0_61 = arith.constant 0 : index
    %c0_62 = arith.constant 0 : index
    %153 = vector.load %arg2[%c0_60, %c2, %c0_61, %c0_62] : memref<1x4x16x64xf32, #tpu.memory_space<vmem>>, vector<1x1x16x64xf32>
    %154 = vector.shape_cast %153 : vector<1x1x16x64xf32> to vector<16x64xf32>
    %cst_63 = arith.constant dense<0.000000e+00> : vector<80x32xf32>
    %155 = tpu.matmul %3, %149, %cst_63 {dimension_numbers = #tpu.dot_dimension_numbers<[1], [0], [0], [1], [0, 0, 1, 1], [], []>} : vector<80x16xf32>, vector<16x32xf32>, vector<80x32xf32> -> vector<80x32xf32>
    %156 = vector.extract_strided_slice %155 {offsets = [0, 0], sizes = [16, 32], strides = [1, 1]} : vector<80x32xf32> to vector<16x32xf32>
    %157 = vector.extract_strided_slice %4 {offsets = [0, 0, 0], sizes = [1, 32, 64], strides = [1, 1, 1]} : vector<5x32x64xf32> to vector<1x32x64xf32>
    %158 = vector.shape_cast %157 : vector<1x32x64xf32> to vector<32x64xf32>
    %cst_64 = arith.constant dense<0.000000e+00> : vector<16x64xf32>
    %159 = tpu.matmul %156, %158, %cst_64 {dimension_numbers = #tpu.dot_dimension_numbers<[1], [0], [0], [1], [0, 0, 1, 1], [], []>} : vector<16x32xf32>, vector<32x64xf32>, vector<16x64xf32> -> vector<16x64xf32>
    %160 = vector.extract_strided_slice %155 {offsets = [16, 0], sizes = [16, 32], strides = [1, 1]} : vector<80x32xf32> to vector<16x32xf32>
    %161 = vector.extract_strided_slice %4 {offsets = [1, 0, 0], sizes = [1, 32, 64], strides = [1, 1, 1]} : vector<5x32x64xf32> to vector<1x32x64xf32>
    %162 = vector.shape_cast %161 : vector<1x32x64xf32> to vector<32x64xf32>
    %cst_65 = arith.constant dense<0.000000e+00> : vector<16x64xf32>
    %163 = tpu.matmul %160, %162, %cst_65 {dimension_numbers = #tpu.dot_dimension_numbers<[1], [0], [0], [1], [0, 0, 1, 1], [], []>} : vector<16x32xf32>, vector<32x64xf32>, vector<16x64xf32> -> vector<16x64xf32>
    %164 = arith.addf %159, %163 : vector<16x64xf32>
    %165 = vector.extract_strided_slice %155 {offsets = [32, 0], sizes = [16, 32], strides = [1, 1]} : vector<80x32xf32> to vector<16x32xf32>
    %166 = vector.extract_strided_slice %4 {offsets = [2, 0, 0], sizes = [1, 32, 64], strides = [1, 1, 1]} : vector<5x32x64xf32> to vector<1x32x64xf32>
    %167 = vector.shape_cast %166 : vector<1x32x64xf32> to vector<32x64xf32>
    %cst_66 = arith.constant dense<0.000000e+00> : vector<16x64xf32>
    %168 = tpu.matmul %165, %167, %cst_66 {dimension_numbers = #tpu.dot_dimension_numbers<[1], [0], [0], [1], [0, 0, 1, 1], [], []>} : vector<16x32xf32>, vector<32x64xf32>, vector<16x64xf32> -> vector<16x64xf32>
    %169 = arith.addf %164, %168 : vector<16x64xf32>
    %170 = vector.extract_strided_slice %155 {offsets = [48, 0], sizes = [16, 32], strides = [1, 1]} : vector<80x32xf32> to vector<16x32xf32>
    %171 = vector.extract_strided_slice %4 {offsets = [3, 0, 0], sizes = [1, 32, 64], strides = [1, 1, 1]} : vector<5x32x64xf32> to vector<1x32x64xf32>
    %172 = vector.shape_cast %171 : vector<1x32x64xf32> to vector<32x64xf32>
    %cst_67 = arith.constant dense<0.000000e+00> : vector<16x64xf32>
    %173 = tpu.matmul %170, %172, %cst_67 {dimension_numbers = #tpu.dot_dimension_numbers<[1], [0], [0], [1], [0, 0, 1, 1], [], []>} : vector<16x32xf32>, vector<32x64xf32>, vector<16x64xf32> -> vector<16x64xf32>
    %174 = arith.addf %169, %173 : vector<16x64xf32>
    %175 = vector.extract_strided_slice %155 {offsets = [64, 0], sizes = [16, 32], strides = [1, 1]} : vector<80x32xf32> to vector<16x32xf32>
    %176 = vector.extract_strided_slice %4 {offsets = [4, 0, 0], sizes = [1, 32, 64], strides = [1, 1, 1]} : vector<5x32x64xf32> to vector<1x32x64xf32>
    %177 = vector.shape_cast %176 : vector<1x32x64xf32> to vector<32x64xf32>
    %cst_68 = arith.constant dense<0.000000e+00> : vector<16x64xf32>
    %178 = tpu.matmul %175, %177, %cst_68 {dimension_numbers = #tpu.dot_dimension_numbers<[1], [0], [0], [1], [0, 0, 1, 1], [], []>} : vector<16x32xf32>, vector<32x64xf32>, vector<16x64xf32> -> vector<16x64xf32>
    %179 = arith.addf %174, %178 : vector<16x64xf32>
    %180 = arith.addf %154, %179 : vector<16x64xf32>
    %181 = arith.negf %180 : vector<16x64xf32>
    %182 = math.exp %181 : vector<16x64xf32>
    %cst_69 = arith.constant 1.000000e+00 : f32
    %183 = vector.broadcast %cst_69 : f32 to vector<16x64xf32>
    %184 = arith.addf %183, %182 : vector<16x64xf32>
    %185 = arith.divf %183, %184 : vector<16x64xf32>
    %186 = vector.extract_strided_slice %185 {offsets = [0, 0], sizes = [16, 32], strides = [1, 1]} : vector<16x64xf32> to vector<16x32xf32>
    %187 = vector.extract_strided_slice %185 {offsets = [0, 32], sizes = [16, 32], strides = [1, 1]} : vector<16x64xf32> to vector<16x32xf32>
    %c0_70 = arith.constant 0 : index
    %c2_71 = arith.constant 2 : index
    %c0_72 = arith.constant 0 : index
    %c0_73 = arith.constant 0 : index
    %188 = vector.load %arg3[%c0_70, %c2_71, %c0_72, %c0_73] : memref<1x4x16x32xf32, #tpu.memory_space<vmem>>, vector<1x1x16x32xf32>
    %189 = vector.shape_cast %188 : vector<1x1x16x32xf32> to vector<16x32xf32>
    %190 = arith.mulf %186, %149 : vector<16x32xf32>
    %cst_74 = arith.constant dense<0.000000e+00> : vector<80x32xf32>
    %191 = tpu.matmul %3, %190, %cst_74 {dimension_numbers = #tpu.dot_dimension_numbers<[1], [0], [0], [1], [0, 0, 1, 1], [], []>} : vector<80x16xf32>, vector<16x32xf32>, vector<80x32xf32> -> vector<80x32xf32>
    %192 = vector.extract_strided_slice %191 {offsets = [0, 0], sizes = [16, 32], strides = [1, 1]} : vector<80x32xf32> to vector<16x32xf32>
    %193 = vector.extract_strided_slice %5 {offsets = [0, 0, 0], sizes = [1, 32, 32], strides = [1, 1, 1]} : vector<5x32x32xf32> to vector<1x32x32xf32>
    %194 = vector.shape_cast %193 : vector<1x32x32xf32> to vector<32x32xf32>
    %cst_75 = arith.constant dense<0.000000e+00> : vector<16x32xf32>
    %195 = tpu.matmul %192, %194, %cst_75 {dimension_numbers = #tpu.dot_dimension_numbers<[1], [0], [0], [1], [0, 0, 1, 1], [], []>} : vector<16x32xf32>, vector<32x32xf32>, vector<16x32xf32> -> vector<16x32xf32>
    %196 = vector.extract_strided_slice %191 {offsets = [16, 0], sizes = [16, 32], strides = [1, 1]} : vector<80x32xf32> to vector<16x32xf32>
    %197 = vector.extract_strided_slice %5 {offsets = [1, 0, 0], sizes = [1, 32, 32], strides = [1, 1, 1]} : vector<5x32x32xf32> to vector<1x32x32xf32>
    %198 = vector.shape_cast %197 : vector<1x32x32xf32> to vector<32x32xf32>
    %cst_76 = arith.constant dense<0.000000e+00> : vector<16x32xf32>
    %199 = tpu.matmul %196, %198, %cst_76 {dimension_numbers = #tpu.dot_dimension_numbers<[1], [0], [0], [1], [0, 0, 1, 1], [], []>} : vector<16x32xf32>, vector<32x32xf32>, vector<16x32xf32> -> vector<16x32xf32>
    %200 = arith.addf %195, %199 : vector<16x32xf32>
    %201 = vector.extract_strided_slice %191 {offsets = [32, 0], sizes = [16, 32], strides = [1, 1]} : vector<80x32xf32> to vector<16x32xf32>
    %202 = vector.extract_strided_slice %5 {offsets = [2, 0, 0], sizes = [1, 32, 32], strides = [1, 1, 1]} : vector<5x32x32xf32> to vector<1x32x32xf32>
    %203 = vector.shape_cast %202 : vector<1x32x32xf32> to vector<32x32xf32>
    %cst_77 = arith.constant dense<0.000000e+00> : vector<16x32xf32>
    %204 = tpu.matmul %201, %203, %cst_77 {dimension_numbers = #tpu.dot_dimension_numbers<[1], [0], [0], [1], [0, 0, 1, 1], [], []>} : vector<16x32xf32>, vector<32x32xf32>, vector<16x32xf32> -> vector<16x32xf32>
    %205 = arith.addf %200, %204 : vector<16x32xf32>
    %206 = vector.extract_strided_slice %191 {offsets = [48, 0], sizes = [16, 32], strides = [1, 1]} : vector<80x32xf32> to vector<16x32xf32>
    %207 = vector.extract_strided_slice %5 {offsets = [3, 0, 0], sizes = [1, 32, 32], strides = [1, 1, 1]} : vector<5x32x32xf32> to vector<1x32x32xf32>
    %208 = vector.shape_cast %207 : vector<1x32x32xf32> to vector<32x32xf32>
    %cst_78 = arith.constant dense<0.000000e+00> : vector<16x32xf32>
    %209 = tpu.matmul %206, %208, %cst_78 {dimension_numbers = #tpu.dot_dimension_numbers<[1], [0], [0], [1], [0, 0, 1, 1], [], []>} : vector<16x32xf32>, vector<32x32xf32>, vector<16x32xf32> -> vector<16x32xf32>
    %210 = arith.addf %205, %209 : vector<16x32xf32>
    %211 = vector.extract_strided_slice %191 {offsets = [64, 0], sizes = [16, 32], strides = [1, 1]} : vector<80x32xf32> to vector<16x32xf32>
    %212 = vector.extract_strided_slice %5 {offsets = [4, 0, 0], sizes = [1, 32, 32], strides = [1, 1, 1]} : vector<5x32x32xf32> to vector<1x32x32xf32>
    %213 = vector.shape_cast %212 : vector<1x32x32xf32> to vector<32x32xf32>
    %cst_79 = arith.constant dense<0.000000e+00> : vector<16x32xf32>
    %214 = tpu.matmul %211, %213, %cst_79 {dimension_numbers = #tpu.dot_dimension_numbers<[1], [0], [0], [1], [0, 0, 1, 1], [], []>} : vector<16x32xf32>, vector<32x32xf32>, vector<16x32xf32> -> vector<16x32xf32>
    %215 = arith.addf %210, %214 : vector<16x32xf32>
    %216 = arith.addf %189, %215 : vector<16x32xf32>
    %217 = math.tanh %216 : vector<16x32xf32>
    %218 = arith.mulf %187, %149 : vector<16x32xf32>
    %cst_80 = arith.constant 1.000000e+00 : f32
    %219 = vector.broadcast %cst_80 : f32 to vector<16x32xf32>
    %220 = arith.subf %219, %187 : vector<16x32xf32>
    %221 = arith.mulf %220, %217 : vector<16x32xf32>
    %222 = arith.addf %218, %221 : vector<16x32xf32>
    %c0_81 = arith.constant 0 : index
    %c2_82 = arith.constant 2 : index
    %c0_83 = arith.constant 0 : index
    %c0_84 = arith.constant 0 : index
    %223 = vector.load %arg8[%c0_81, %c2_82, %c0_83, %c0_84] : memref<1x4x16x32xf32, #tpu.memory_space<vmem>>, vector<1x1x16x32xf32>
    %224 = vector.shape_cast %223 : vector<1x1x16x32xf32> to vector<16x32xf32>
    %225 = vector.shape_cast %222 : vector<16x32xf32> to vector<1x1x16x32xf32>
    tpu.vector_store %arg8[%c0_81, %c2_82, %c0_83, %c0_84], %225 {strides = array<i32>} : memref<1x4x16x32xf32, #tpu.memory_space<vmem>>, vector<1x1x16x32xf32>,
    %c0_85 = arith.constant 0 : index
    %c3 = arith.constant 3 : index
    %c0_86 = arith.constant 0 : index
    %c0_87 = arith.constant 0 : index
    %226 = vector.load %arg2[%c0_85, %c3, %c0_86, %c0_87] : memref<1x4x16x64xf32, #tpu.memory_space<vmem>>, vector<1x1x16x64xf32>
    %227 = vector.shape_cast %226 : vector<1x1x16x64xf32> to vector<16x64xf32>
    %cst_88 = arith.constant dense<0.000000e+00> : vector<80x32xf32>
    %228 = tpu.matmul %3, %222, %cst_88 {dimension_numbers = #tpu.dot_dimension_numbers<[1], [0], [0], [1], [0, 0, 1, 1], [], []>} : vector<80x16xf32>, vector<16x32xf32>, vector<80x32xf32> -> vector<80x32xf32>
    %229 = vector.extract_strided_slice %228 {offsets = [0, 0], sizes = [16, 32], strides = [1, 1]} : vector<80x32xf32> to vector<16x32xf32>
    %230 = vector.extract_strided_slice %4 {offsets = [0, 0, 0], sizes = [1, 32, 64], strides = [1, 1, 1]} : vector<5x32x64xf32> to vector<1x32x64xf32>
    %231 = vector.shape_cast %230 : vector<1x32x64xf32> to vector<32x64xf32>
    %cst_89 = arith.constant dense<0.000000e+00> : vector<16x64xf32>
    %232 = tpu.matmul %229, %231, %cst_89 {dimension_numbers = #tpu.dot_dimension_numbers<[1], [0], [0], [1], [0, 0, 1, 1], [], []>} : vector<16x32xf32>, vector<32x64xf32>, vector<16x64xf32> -> vector<16x64xf32>
    %233 = vector.extract_strided_slice %228 {offsets = [16, 0], sizes = [16, 32], strides = [1, 1]} : vector<80x32xf32> to vector<16x32xf32>
    %234 = vector.extract_strided_slice %4 {offsets = [1, 0, 0], sizes = [1, 32, 64], strides = [1, 1, 1]} : vector<5x32x64xf32> to vector<1x32x64xf32>
    %235 = vector.shape_cast %234 : vector<1x32x64xf32> to vector<32x64xf32>
    %cst_90 = arith.constant dense<0.000000e+00> : vector<16x64xf32>
    %236 = tpu.matmul %233, %235, %cst_90 {dimension_numbers = #tpu.dot_dimension_numbers<[1], [0], [0], [1], [0, 0, 1, 1], [], []>} : vector<16x32xf32>, vector<32x64xf32>, vector<16x64xf32> -> vector<16x64xf32>
    %237 = arith.addf %232, %236 : vector<16x64xf32>
    %238 = vector.extract_strided_slice %228 {offsets = [32, 0], sizes = [16, 32], strides = [1, 1]} : vector<80x32xf32> to vector<16x32xf32>
    %239 = vector.extract_strided_slice %4 {offsets = [2, 0, 0], sizes = [1, 32, 64], strides = [1, 1, 1]} : vector<5x32x64xf32> to vector<1x32x64xf32>
    %240 = vector.shape_cast %239 : vector<1x32x64xf32> to vector<32x64xf32>
    %cst_91 = arith.constant dense<0.000000e+00> : vector<16x64xf32>
    %241 = tpu.matmul %238, %240, %cst_91 {dimension_numbers = #tpu.dot_dimension_numbers<[1], [0], [0], [1], [0, 0, 1, 1], [], []>} : vector<16x32xf32>, vector<32x64xf32>, vector<16x64xf32> -> vector<16x64xf32>
    %242 = arith.addf %237, %241 : vector<16x64xf32>
    %243 = vector.extract_strided_slice %228 {offsets = [48, 0], sizes = [16, 32], strides = [1, 1]} : vector<80x32xf32> to vector<16x32xf32>
    %244 = vector.extract_strided_slice %4 {offsets = [3, 0, 0], sizes = [1, 32, 64], strides = [1, 1, 1]} : vector<5x32x64xf32> to vector<1x32x64xf32>
    %245 = vector.shape_cast %244 : vector<1x32x64xf32> to vector<32x64xf32>
    %cst_92 = arith.constant dense<0.000000e+00> : vector<16x64xf32>
    %246 = tpu.matmul %243, %245, %cst_92 {dimension_numbers = #tpu.dot_dimension_numbers<[1], [0], [0], [1], [0, 0, 1, 1], [], []>} : vector<16x32xf32>, vector<32x64xf32>, vector<16x64xf32> -> vector<16x64xf32>
    %247 = arith.addf %242, %246 : vector<16x64xf32>
    %248 = vector.extract_strided_slice %228 {offsets = [64, 0], sizes = [16, 32], strides = [1, 1]} : vector<80x32xf32> to vector<16x32xf32>
    %249 = vector.extract_strided_slice %4 {offsets = [4, 0, 0], sizes = [1, 32, 64], strides = [1, 1, 1]} : vector<5x32x64xf32> to vector<1x32x64xf32>
    %250 = vector.shape_cast %249 : vector<1x32x64xf32> to vector<32x64xf32>
    %cst_93 = arith.constant dense<0.000000e+00> : vector<16x64xf32>
    %251 = tpu.matmul %248, %250, %cst_93 {dimension_numbers = #tpu.dot_dimension_numbers<[1], [0], [0], [1], [0, 0, 1, 1], [], []>} : vector<16x32xf32>, vector<32x64xf32>, vector<16x64xf32> -> vector<16x64xf32>
    %252 = arith.addf %247, %251 : vector<16x64xf32>
    %253 = arith.addf %227, %252 : vector<16x64xf32>
    %254 = arith.negf %253 : vector<16x64xf32>
    %255 = math.exp %254 : vector<16x64xf32>
    %cst_94 = arith.constant 1.000000e+00 : f32
    %256 = vector.broadcast %cst_94 : f32 to vector<16x64xf32>
    %257 = arith.addf %256, %255 : vector<16x64xf32>
    %258 = arith.divf %256, %257 : vector<16x64xf32>
    %259 = vector.extract_strided_slice %258 {offsets = [0, 0], sizes = [16, 32], strides = [1, 1]} : vector<16x64xf32> to vector<16x32xf32>
    %260 = vector.extract_strided_slice %258 {offsets = [0, 32], sizes = [16, 32], strides = [1, 1]} : vector<16x64xf32> to vector<16x32xf32>
    %c0_95 = arith.constant 0 : index
    %c3_96 = arith.constant 3 : index
    %c0_97 = arith.constant 0 : index
    %c0_98 = arith.constant 0 : index
    %261 = vector.load %arg3[%c0_95, %c3_96, %c0_97, %c0_98] : memref<1x4x16x32xf32, #tpu.memory_space<vmem>>, vector<1x1x16x32xf32>
    %262 = vector.shape_cast %261 : vector<1x1x16x32xf32> to vector<16x32xf32>
    %263 = arith.mulf %259, %222 : vector<16x32xf32>
    %cst_99 = arith.constant dense<0.000000e+00> : vector<80x32xf32>
    %264 = tpu.matmul %3, %263, %cst_99 {dimension_numbers = #tpu.dot_dimension_numbers<[1], [0], [0], [1], [0, 0, 1, 1], [], []>} : vector<80x16xf32>, vector<16x32xf32>, vector<80x32xf32> -> vector<80x32xf32>
    %265 = vector.extract_strided_slice %264 {offsets = [0, 0], sizes = [16, 32], strides = [1, 1]} : vector<80x32xf32> to vector<16x32xf32>
    %266 = vector.extract_strided_slice %5 {offsets = [0, 0, 0], sizes = [1, 32, 32], strides = [1, 1, 1]} : vector<5x32x32xf32> to vector<1x32x32xf32>
    %267 = vector.shape_cast %266 : vector<1x32x32xf32> to vector<32x32xf32>
    %cst_100 = arith.constant dense<0.000000e+00> : vector<16x32xf32>
    %268 = tpu.matmul %265, %267, %cst_100 {dimension_numbers = #tpu.dot_dimension_numbers<[1], [0], [0], [1], [0, 0, 1, 1], [], []>} : vector<16x32xf32>, vector<32x32xf32>, vector<16x32xf32> -> vector<16x32xf32>
    %269 = vector.extract_strided_slice %264 {offsets = [16, 0], sizes = [16, 32], strides = [1, 1]} : vector<80x32xf32> to vector<16x32xf32>
    %270 = vector.extract_strided_slice %5 {offsets = [1, 0, 0], sizes = [1, 32, 32], strides = [1, 1, 1]} : vector<5x32x32xf32> to vector<1x32x32xf32>
    %271 = vector.shape_cast %270 : vector<1x32x32xf32> to vector<32x32xf32>
    %cst_101 = arith.constant dense<0.000000e+00> : vector<16x32xf32>
    %272 = tpu.matmul %269, %271, %cst_101 {dimension_numbers = #tpu.dot_dimension_numbers<[1], [0], [0], [1], [0, 0, 1, 1], [], []>} : vector<16x32xf32>, vector<32x32xf32>, vector<16x32xf32> -> vector<16x32xf32>
    %273 = arith.addf %268, %272 : vector<16x32xf32>
    %274 = vector.extract_strided_slice %264 {offsets = [32, 0], sizes = [16, 32], strides = [1, 1]} : vector<80x32xf32> to vector<16x32xf32>
    %275 = vector.extract_strided_slice %5 {offsets = [2, 0, 0], sizes = [1, 32, 32], strides = [1, 1, 1]} : vector<5x32x32xf32> to vector<1x32x32xf32>
    %276 = vector.shape_cast %275 : vector<1x32x32xf32> to vector<32x32xf32>
    %cst_102 = arith.constant dense<0.000000e+00> : vector<16x32xf32>
    %277 = tpu.matmul %274, %276, %cst_102 {dimension_numbers = #tpu.dot_dimension_numbers<[1], [0], [0], [1], [0, 0, 1, 1], [], []>} : vector<16x32xf32>, vector<32x32xf32>, vector<16x32xf32> -> vector<16x32xf32>
    %278 = arith.addf %273, %277 : vector<16x32xf32>
    %279 = vector.extract_strided_slice %264 {offsets = [48, 0], sizes = [16, 32], strides = [1, 1]} : vector<80x32xf32> to vector<16x32xf32>
    %280 = vector.extract_strided_slice %5 {offsets = [3, 0, 0], sizes = [1, 32, 32], strides = [1, 1, 1]} : vector<5x32x32xf32> to vector<1x32x32xf32>
    %281 = vector.shape_cast %280 : vector<1x32x32xf32> to vector<32x32xf32>
    %cst_103 = arith.constant dense<0.000000e+00> : vector<16x32xf32>
    %282 = tpu.matmul %279, %281, %cst_103 {dimension_numbers = #tpu.dot_dimension_numbers<[1], [0], [0], [1], [0, 0, 1, 1], [], []>} : vector<16x32xf32>, vector<32x32xf32>, vector<16x32xf32> -> vector<16x32xf32>
    %283 = arith.addf %278, %282 : vector<16x32xf32>
    %284 = vector.extract_strided_slice %264 {offsets = [64, 0], sizes = [16, 32], strides = [1, 1]} : vector<80x32xf32> to vector<16x32xf32>
    %285 = vector.extract_strided_slice %5 {offsets = [4, 0, 0], sizes = [1, 32, 32], strides = [1, 1, 1]} : vector<5x32x32xf32> to vector<1x32x32xf32>
    %286 = vector.shape_cast %285 : vector<1x32x32xf32> to vector<32x32xf32>
    %cst_104 = arith.constant dense<0.000000e+00> : vector<16x32xf32>
    %287 = tpu.matmul %284, %286, %cst_104 {dimension_numbers = #tpu.dot_dimension_numbers<[1], [0], [0], [1], [0, 0, 1, 1], [], []>} : vector<16x32xf32>, vector<32x32xf32>, vector<16x32xf32> -> vector<16x32xf32>
    %288 = arith.addf %283, %287 : vector<16x32xf32>
    %289 = arith.addf %262, %288 : vector<16x32xf32>
    %290 = math.tanh %289 : vector<16x32xf32>
    %291 = arith.mulf %260, %222 : vector<16x32xf32>
    %cst_105 = arith.constant 1.000000e+00 : f32
    %292 = vector.broadcast %cst_105 : f32 to vector<16x32xf32>
    %293 = arith.subf %292, %260 : vector<16x32xf32>
    %294 = arith.mulf %293, %290 : vector<16x32xf32>
    %295 = arith.addf %291, %294 : vector<16x32xf32>
    %c0_106 = arith.constant 0 : index
    %c3_107 = arith.constant 3 : index
    %c0_108 = arith.constant 0 : index
    %c0_109 = arith.constant 0 : index
    %296 = vector.load %arg8[%c0_106, %c3_107, %c0_108, %c0_109] : memref<1x4x16x32xf32, #tpu.memory_space<vmem>>, vector<1x1x16x32xf32>
    %297 = vector.shape_cast %296 : vector<1x1x16x32xf32> to vector<16x32xf32>
    %298 = vector.shape_cast %295 : vector<16x32xf32> to vector<1x1x16x32xf32>
    tpu.vector_store %arg8[%c0_106, %c3_107, %c0_108, %c0_109], %298 {strides = array<i32>} : memref<1x4x16x32xf32, #tpu.memory_space<vmem>>, vector<1x1x16x32xf32>,
    %c0_110 = arith.constant 0 : index
    %c0_111 = arith.constant 0 : index
    %299 = vector.load %arg9[%c0_110, %c0_111] : memref<16x32xf32, #tpu.memory_space<vmem>>, vector<16x32xf32>
    tpu.vector_store %arg9[%c0_110, %c0_111], %295 {strides = array<i32>} : memref<16x32xf32, #tpu.memory_space<vmem>>, vector<16x32xf32>,
    return
  }
  func.func @transform_0(%arg0: i32, %arg1: i32) -> (i32, i32, i32, i32) {
    %c0_i32 = arith.constant 0 : i32
    %c0_i32_0 = arith.constant 0 : i32
    %c0_i32_1 = arith.constant 0 : i32
    return %arg0, %arg1, %c0_i32, %c0_i32_0 : i32, i32, i32, i32
  }
  func.func @transform_1(%arg0: i32, %arg1: i32) -> (i32, i32, i32, i32) {
    %c0_i32 = arith.constant 0 : i32
    %c0_i32_0 = arith.constant 0 : i32
    %c0_i32_1 = arith.constant 0 : i32
    return %arg0, %arg1, %c0_i32, %c0_i32_0 : i32, i32, i32, i32
  }
  func.func @transform_2(%arg0: i32, %arg1: i32) -> (i32, i32, i32) {
    %c0_i32 = arith.constant 0 : i32
    %c0_i32_0 = arith.constant 0 : i32
    %c0_i32_1 = arith.constant 0 : i32
    return %arg0, %c0_i32, %c0_i32_0 : i32, i32, i32
  }
  func.func @transform_3(%arg0: i32, %arg1: i32) -> (i32, i32) {
    %c0_i32 = arith.constant 0 : i32
    %c0_i32_0 = arith.constant 0 : i32
    %c0_i32_1 = arith.constant 0 : i32
    return %c0_i32, %c0_i32_0 : i32, i32
  }
  func.func @transform_4(%arg0: i32, %arg1: i32) -> (i32, i32, i32) {
    %c0_i32 = arith.constant 0 : i32
    %c0_i32_0 = arith.constant 0 : i32
    %c0_i32_1 = arith.constant 0 : i32
    %c0_i32_2 = arith.constant 0 : i32
    return %c0_i32, %c0_i32_0, %c0_i32_1 : i32, i32, i32
  }
  func.func @transform_5(%arg0: i32, %arg1: i32) -> (i32, i32, i32) {
    %c0_i32 = arith.constant 0 : i32
    %c0_i32_0 = arith.constant 0 : i32
    %c0_i32_1 = arith.constant 0 : i32
    %c0_i32_2 = arith.constant 0 : i32
    return %c0_i32, %c0_i32_0, %c0_i32_1 : i32, i32, i32
  }
  func.func @transform_6(%arg0: i32, %arg1: i32) -> (i32, i32, i32, i32) {
    %c0_i32 = arith.constant 0 : i32
    %c0_i32_0 = arith.constant 0 : i32
    %c0_i32_1 = arith.constant 0 : i32
    return %arg0, %arg1, %c0_i32, %c0_i32_0 : i32, i32, i32, i32
  }
}

</mosaic_0001>

<bundles_post_ra>
// kernel: tpu_custom_call.1
= control target key start
LH: loop header
LB: loop body
LE: loop exit
PB: predicated region body
PF: predicated region fallthrough
CT: control target
= control target key end

     0   :  { %s8114_s0 = inlined_call_operand.hbm [shape: f32[2,8,16,64], index: 0, kind: input, shape index: {}]   ;;  %s8115_s1 = inlined_call_operand.hbm [shape: f32[2,8,16,32], index: 1, kind: input, shape index: {}]   ;;  %s8116_s2 = inlined_call_operand.vmem [shape: f32[2,16,32], index: 2, kind: input, shape index: {}]   ;;  %s8117_s3 = inlined_call_operand.vmem [shape: f32[80,16], index: 3, kind: input, shape index: {}]   ;;  %s8118_s4 = inlined_call_operand.hbm [shape: f32[5,32,64], index: 4, kind: input, shape index: {}]   ;;  %s8119_s5 = inlined_call_operand.hbm [shape: f32[5,32,32], index: 5, kind: input, shape index: {}]   ;;  %s8120_s6 = inlined_call_operand.hbm [shape: f32[2,8,16,32], index: 6, kind: output, shape index: {}]  }
   0x1   :  { %8135 = sst [smem:[#allocation21_spill]] %s8117_s3 }
   0x2   :  { %8136 = sst [smem:[#allocation22_spill]] %s8118_s4 }
   0x3   :  { %8137 = sst [smem:[#allocation23_spill]] %s8119_s5 }
   0x4   :  { %8138 = sst [smem:[#allocation24_spill]] %s8120_s6 }
   0x5   :  { %11 = vsyncpa [#allocation4], 0 }
   0x6   :  { %13 = vsyncpa [#allocation4 + $0x1], 0 }
   0x7   :  { %14 = vsyncpa [#allocation7], 0 }
   0x8   :  { %16 = vsyncpa [#allocation7 + $0x1], 0 }
   0x9   :  { %17 = vsyncpa [#allocation10], 0 }
   0xa   :  { %18 = vsyncpa [#allocation5], 0 }
   0xb   :  { %20 = vsyncpa [#allocation5 + $0x1], 0  ;;  %s7078_s21 = smov 0   ;;  %s7080_s22 = smov 0  }
   0xc   :  { %s7082_s23 = smov 0   ;;  %s7084_s24 = smov 0  }
   0xd   :  { %s7086_s25 = smov 0   ;;  %s7088_s26 = smov 0  }
   0xe   :  { %s7090_s27 = smov 0   ;;  %s7092_s28 = smov 0  }
   0xf LB: > { %8139 = sst [smem:[#allocation17_spill]] %s7002_s21  ;;  %s7119_s29 = sadd.s32 4294967295, %s7030_s28   ;;  %s7030_s28 = sphi %s7092_s28, %s26_s28   ;;  %s7026_s27 = sphi %s7090_s27, %s8174_s27   ;;  %s7022_s26 = sphi %s7088_s26, %s8173_s26   ;;  %s7018_s25 = sphi %s7086_s25, %s8172_s25   ;;  %s7014_s24 = sphi %s7084_s24, %s8171_s24   ;;  %s7010_s23 = sphi %s7082_s23, %s8170_s23   ;;  %s7006_s22 = sphi %s7080_s22, %s8169_s22   ;;  %s7002_s21 = sphi %s7078_s21, %s8168_s21  }
  0x10   : > { %s5071_s30 = sadd.s32 4294967294, %s7030_s28   ;;  %p60_p0 = scmp.ne.s32.totalorder %s7006_s22, %s7002_s21 }
  0x11   : > { %p8121_p1 = scmp.eq.s32.totalorder %s7119_s29, 0  ;;  %p209_p3 = scmp.eq.s32.totalorder %s5071_s30, 3 }
  0x12   : > { %p5072_p5 = scmp.ge.s32.totalorder %s7030_s28, 1  ;;  %p216_p7 = scmp.lt.s32.totalorder %s7030_s28, 5 }
  0x13   : > { %p7128_p4 = por %p8121_p1, %p60_p0  ;;  %p7133_p6 = por %p209_p3, %p60_p0 }
  0x14   : > { %p7138_p8 = pnand %p5072_p5, %p216_p7  ;;  %s7032_s10 = smov [#allocation8]  }
  0x15   : > { %s8140_s7 = scalar_select %p7128_p4, 1, 0 }
  0x16   : > { %s8141_s8 = scalar_select %p7133_p6, 1, 0 }
  0x17   : > { %s8143_s9 = scalar_select %p7138_p8, 1, 0 }
  0x18   : > { %8142 = sst [smem:[#allocation18_spill]] %s8141_s8  ;;  %s231_s11 = sshll.u32 %s7032_s10, 4  ;;  %s232_s11 = int_to_ptr.vmem [resolvable:$true] %s231_s11 }
  0x19   : > { %p6650_p9 = pneg %p7138_p8  ;;  %s7033_s13 = smov [#allocation9]  }
  0x1a   : > { %s244_s14 = sshll.u32 %s7033_s13, 4  ;;  %s8145_s4 = sld [smem:[#allocation22_spill]]  ;;  %s7150_s14 = int_to_ptr.vmem [resolvable:$true] %s244_s14 }
  0x1b   : > { %p7146_p10 = pnand %p6650_p9, %p8121_p1 }
  0x1d   : > { %p6806_p12 = pneg %p7146_p10 }
  0x20   : > { %s6804_s17 = scalar_lea.hbm %s8145_s4, 2560 }
  0x21   : > { %p6805_p11 = scmp.ne.s32.totalorder %s8145_s4, %s6804_s17  ;;  %p6811_p3 = scmp.lt.u32.totalorder %s6804_s17, %s8145_s4 }
  0x23   : > { %p6807_p13 = pnand %p6806_p12, %p6805_p11 }
  0x25   : > { %p6808_p0 = pneg %p6807_p13 }
  0x27   : > { %p6813_p5 = pnand %p6811_p3, %p6808_p0 }
  0x29   : > { %6816 = shalt.err (!%p6813_p5)
}
  0x2a   : > { %s6817_s10 = scalar_lea.vmem %s232_s11, 2560  ;;  %p6825_p2 = scmp.lt.s32.totalorder %s232_s11, %s232_s11 }
  0x2b   : > { %p6818_p7 = scmp.ne.s32.totalorder %s232_s11, %s6817_s10  ;;  %p6826_p6 = scmp.lt.s32.totalorder %s6817_s10, %s6817_s10 }
  0x2d   : > { %p6820_p9 = pnand %p6818_p7, %p6806_p12  ;;  %p6827_p4 = por %p6826_p6, %p6825_p2 }
  0x2f   : > { %p6821_p1 = pneg %p6820_p9 }
  0x31   : > { %p6828_p8 = pnand %p6827_p4, %p6821_p1 }
  0x33   : > { %6831 = shalt.err (!%p6828_p8)
}
  0x34   : > { %s8126_s13 = smov 128   ;;  %s8128_s15 = smov 8  }
  0x35   : > { %6653 = dma.hbm_to_vmem [thread:$0]  (!%p7146_p10), %s8145_s4, 2560, %s232_s11, [#allocation7], %s8126_s13, %s8126_s13, %s8128_s15  }
  0x36   : > { %s8146_s5 = sld [smem:[#allocation23_spill]] }
  0x3c   : > { %s6832_s20 = scalar_lea.hbm %s8146_s5, 2560 }
  0x3d   : > { %p6833_p1 = scmp.ne.s32.totalorder %s8146_s5, %s6832_s20  ;;  %p6839_p6 = scmp.lt.u32.totalorder %s6832_s20, %s8146_s5 }
  0x3f   : > { %p6835_p2 = pnand %p6833_p1, %p6806_p12 }
  0x41   : > { %p6836_p4 = pneg %p6835_p2 }
  0x43   : > { %p6841_p8 = pnand %p6839_p6, %p6836_p4 }
  0x45   : > { %6844 = shalt.err (!%p6841_p8)
}
  0x46   : > { %s6845_s11 = scalar_lea.vmem %s7150_s14, 2560  ;;  %p6853_p3 = scmp.lt.s32.totalorder %s7150_s14, %s7150_s14 }
  0x47   : > { %p6846_p11 = scmp.ne.s32.totalorder %s7150_s14, %s6845_s11  ;;  %p6854_p5 = scmp.lt.s32.totalorder %s6845_s11, %s6845_s11 }
  0x49   : > { %p6848_p13 = pnand %p6846_p11, %p6806_p12  ;;  %p6855_p7 = por %p6854_p5, %p6853_p3 }
  0x4b   : > { %p6849_p0 = pneg %p6848_p13 }
  0x4d   : > { %p6856_p9 = pnand %p6855_p7, %p6849_p0 }
  0x4f   : > { %6859 = shalt.err (!%p6856_p9)
}
  0x50   : > { %6656 = dma.hbm_to_vmem [thread:$0]  (!%p7146_p10), %s8146_s5, 2560, %s7150_s14, [#allocation10], %s8126_s13, %s8126_s13, %s8128_s15  }
  0x51   : > { %s35_s12 = sadd.s32 1, %s7022_s26  ;;  %s38_s16 = sadd.s32 1, %s7026_s27 }
  0x52   : > { %p36_p12 = scmp.ge.s32.totalorder %s35_s12, 2  ;;  %s47_s17 = sadd.s32 1, %s7010_s23 }
  0x53   : > { %p54_p1 = scmp.ne.s32.totalorder %s7010_s23, %s7006_s22  ;;  %p55_p2 = scmp.eq.s32.totalorder %s7030_s28, 0 }
  0x54   : > { %s8176_s12 = smov (%p36_p12, %s35_s12), 0  ;;  %s8178_s16 = smov (!%p36_p12, %s38_s16), %s7026_s27 }
  0x55   : > { %8147 = sst [smem:[#allocation19_spill]] %s8176_s12  ;;  %s43_s18 = ssub.s32 %s7022_s26, %s8176_s12 }
  0x56   : > { %p7216_p4 = por %p55_p2, %p54_p1  ;;  %p40_p10 = scmp.ge.s32.totalorder %s8178_s16, 2 }
  0x57   : > { %p8149_p6 = scmp.eq.s32.totalorder %s7119_s29, 3  ;;  %p6670_p11 = scmp.lt.s32.totalorder %s7030_s28, 4 }
  0x58   : > { %s258_s20 = sand.u32 1, %s7010_s23   ;;  %s8180_s16 = smov (%p40_p10, %s8178_s16), 0 }
  0x59   : > { %p7222_p8 = por %p8149_p6, %p54_p1  ;;  %s5076_s30 = sshll.u32 %s258_s20, 6 }
  0x5a   : > { %s42_s10 = ssub.s32 %s7026_s27, %s8180_s16  ;;  %s5288_s21 = sshll.u32 %s7022_s26, 3 }
  0x5b   : > { %s8150_s14 = scalar_select %p7222_p8, 1, 0 }
  0x5c   : > { %s44_s11 = sor.u32 %s43_s18, %s42_s10  ;;  %s5079_s8 = sshll.u32 %s7026_s27, 4 }
  0x5d   : > { %8151 = sst [smem:[#allocation20_spill]] %s8150_s14  ;;  %p45_p13 = scmp.eq.s32.totalorder %s44_s11, 0 }
  0x5e   : > { %s269_s13 = sadd.s32 %s5288_s21, %s5079_s8  ;;  %s262_s15 = scalar_lea.vmem [#allocation3], %s5076_s30 }
  0x5f   : > { %s272_s4 = sshll.u32 %s262_s15, 4  ;;  %s5080_s12 = sshll.u32 %s269_s13, 7  ;;  %s7237_s4 = int_to_ptr.vmem [resolvable:$true] %s272_s4 }
  0x60   : > { %s7235_s5 = scalar_select %p45_p13, %s7010_s23, %s47_s17  }
  0x61   : > { %s7242_s3 = scalar_lea.hbm %s8114_s0, %s5080_s12  ;;  %p7248_p0 = pnand %p6670_p11, %p7216_p4 }
  0x62   : > { %s7255_s13 = scalar_lea.hbm %s8115_s1, %s5080_s12  ;;  %s286_s6 = scalar_lea.vmem [#allocation6], %s5076_s30 }
  0x63   : > { %s7257_s14 = sshll.u32 %s286_s6, 4  ;;  %s7259_s19 = scalar_lea.sflag [#allocation4], %s258_s20  ;;  %s7291_s14 = int_to_ptr.vmem [resolvable:$true] %s7257_s14 }
  0x64   : > { %s6860_s10 = scalar_lea.hbm %s7242_s3, 1024  ;;  %p6862_p5 = pneg %p7248_p0 }
  0x65   : > { %p6861_p3 = scmp.ne.s32.totalorder %s7242_s3, %s6860_s10  ;;  %s6865_s8 = scalar_lea.hbm %s8114_s0, 4096 }
  0x66   : > { %p6866_p12 = scmp.lt.u32.totalorder %s7242_s3, %s8114_s0  ;;  %p6867_p1 = scmp.lt.u32.totalorder %s6865_s8, %s6860_s10 }
  0x67   : > { %p6863_p7 = pnand %p6862_p5, %p6861_p3  ;;  %p6869_p4 = scmp.lt.u32.totalorder %s6860_s10, %s7242_s3 }
  0x68   : > { %p6868_p2 = por %p6867_p1, %p6866_p12 }
  0x69   : > { %p6864_p9 = pneg %p6863_p7 }
  0x6a   : > { %p6870_p10 = por %p6869_p4, %p6868_p2 }
  0x6c   : > { %p6871_p6 = pnand %p6870_p10, %p6864_p9 }
  0x6e   : > { %6874 = shalt.err (!%p6871_p6)
}
  0x6f   : > { %s6875_s20 = scalar_lea.vmem %s7237_s4, 1024  ;;  %s7036_s30 = smov [#allocation3]  }
  0x70   : > { %p6876_p11 = scmp.ne.s32.totalorder %s7237_s4, %s6875_s20  ;;  %s6880_s17 = sshll.u32 %s7036_s30, 4  ;;  %s6881_s17 = int_to_ptr.vmem [resolvable:$false] %s6880_s17 }
  0x71   : > { %s6882_s6 = scalar_lea.vmem %s6881_s17, 2048  ;;  %p6883_p7 = scmp.lt.s32.totalorder %s7237_s4, %s6881_s17 }
  0x72   : > { %p6878_p13 = pnand %p6876_p11, %p6862_p5  ;;  %p6884_p12 = scmp.lt.s32.totalorder %s6882_s6, %s6875_s20 }
  0x74   : > { %p6879_p3 = pneg %p6878_p13  ;;  %p6885_p1 = por %p6884_p12, %p6883_p7 }
  0x76   : > { %p6886_p2 = pnand %p6885_p1, %p6879_p3 }
  0x78   : > { %6889 = shalt.err (!%p6886_p2)
}
  0x79   : > { %s8153_s10 = smov 8   ;;  %s8154_s11 = smov 128  }
  0x7a   : > { %6660 = dma.hbm_to_vmem [thread:$0]  (!%p7248_p0), %s7242_s3, 1024, %s7237_s4, %s7259_s19, %s8154_s11, %s8154_s11, %s8153_s10  }
  0x7b   : > { %s282_s21 = sand.u32 1, %s7030_s28   ;;  %s6890_s15 = scalar_lea.hbm %s7255_s13, 1024 }
  0x7c   : > { %s7294_s8 = scalar_lea.sflag [#allocation7], %s282_s21  ;;  %p6891_p9 = scmp.ne.s32.totalorder %s7255_s13, %s6890_s15 }
  0x7d   : > { %s6895_s30 = scalar_lea.hbm %s8115_s1, 4096  ;;  %p6896_p6 = scmp.lt.u32.totalorder %s7255_s13, %s8115_s1 }
  0x7e   : > { %p6893_p4 = pnand %p6891_p9, %p6862_p5  ;;  %p6897_p11 = scmp.lt.u32.totalorder %s6895_s30, %s6890_s15 }
  0x7f   : > { %p6899_p3 = scmp.lt.u32.totalorder %s6890_s15, %s7255_s13 }
  0x80   : > { %p6894_p10 = pneg %p6893_p4  ;;  %p6898_p13 = por %p6897_p11, %p6896_p6 }
  0x82   : > { %p6900_p7 = por %p6899_p3, %p6898_p13 }
  0x84   : > { %p6901_p12 = pnand %p6900_p7, %p6894_p10 }
  0x86   : > { %6904 = shalt.err (!%p6901_p12)
}
  0x87   : > { %s6905_s3 = scalar_lea.vmem %s7291_s14, 1024  ;;  %s7037_s4 = smov [#allocation6]  }
  0x88   : > { %p6906_p1 = scmp.ne.s32.totalorder %s7291_s14, %s6905_s3  ;;  %s6910_s19 = sshll.u32 %s7037_s4, 4  ;;  %s6911_s19 = int_to_ptr.vmem [resolvable:$false] %s6910_s19 }
  0x89   : > { %s6912_s21 = scalar_lea.vmem %s6911_s19, 2048  ;;  %p6913_p4 = scmp.lt.s32.totalorder %s7291_s14, %s6911_s19 }
  0x8a   : > { %p6908_p2 = pnand %p6906_p1, %p6862_p5  ;;  %p6914_p6 = scmp.lt.s32.totalorder %s6912_s21, %s6905_s3 }
  0x8c   : > { %p6909_p9 = pneg %p6908_p2  ;;  %p6915_p11 = por %p6914_p6, %p6913_p4 }
  0x8e   : > { %p6916_p13 = pnand %p6915_p11, %p6909_p9 }
  0x90   : > { %6919 = shalt.err (!%p6916_p13)
}
  0x91   : > { %6663 = dma.hbm_to_vmem [thread:$0]  (!%p7248_p0), %s7255_s13, 1024, %s7291_s14, %s7294_s8, %s8154_s11, %s8154_s11, %s8153_s10  }
  0x92   : > { %p8155_p5 = scmp.ne.s32.totalorder %s8143_s9, 0 }
  0x93   : > { %s7326_s15 = sand.u32 (!%p8155_p5), 1, %s7006_s22   ;;  %p8156_p10 = scmp.ne.s32.totalorder (!%p8155_p5), %s8140_s7, 0 }
  0x94   : > { %316 = sbr.rel (%p8155_p5) target bundleno = 5060 (0x13c4), region = 44  ;;  %s5087_s12 = sshll.u32 (!%p8155_p5), %s7326_s15, 6 }
  0x95   : > { %s319_s20 = scalar_lea.sflag (!%p8155_p5), [#allocation4], %s7326_s15  ;;  %s7330_s30 = scalar_lea.vmem (!%p8155_p5), [#allocation3], %s5087_s12 }
  0x9b   : > { %6981 = dma.done.wait (%p8156_p10), %s319_s20, 1024  }
  0x9c   : > { %6983 = vsyncadd (%p8156_p10), %s319_s20, 4294966272  ;;  %s327_s18 = sand.u32 1, %s7119_s29   ;;  %s7337_s13 = scalar_lea.vmem [#allocation6], %s5087_s12 }
  0x9d   : > { %s328_s9 = scalar_lea.sflag [#allocation7], %s327_s18 }
  0x9e   : > { %6985 = dma.done.wait (%p8156_p10), %s328_s9, 1024  }
  0x9f   : > { %6987 = vsyncadd (%p8156_p10), %s328_s9, 4294966272  ;;  %p8157_p0 = scmp.eq.s32.totalorder %s7119_s29, 0 }
  0xa1   : > { %6989 = dma.done.wait (%p8157_p0), [#allocation7], 2560   ;;  %p8158_p3 = pmov %p8157_p0 }
  0xa2   : > { %p8159_p7 = pmov %p8157_p0 }
  0xa3   : > { %6991 = vsyncadd (%p8158_p3), [#allocation7], 4294964736 }
  0xa4   : > { %6993 = dma.done.wait (%p8159_p7), [#allocation10], 2560   ;;  %p8160_p12 = pmov %p8157_p0 }
  0xa5   : > { %p380_p1 = scmp.lt.s32.totalorder %s7018_s25, 1  ;;  %s7356_s17 = scalar_lea.vmem [#allocation11], %s5087_s12 }
  0xa6   : > { %6995 = vsyncadd (%p8160_p12), [#allocation10], 4294964736  ;;  %p5094_p2 = scmp.ne.s32.totalorder %s7014_s24, 0 }
  0xa7   : > { %s381_s14 = scalar_select %p380_p1, %s7018_s25, 1 }
  0xa8   : > { %389 = sbr.rel (%p5094_p2) target bundleno = 175 (0xaf), region = 64  ;;  %vm392_vm0 = vcmask (!%p5094_p2), 261120  }
  0xa9   : > { %s5290_s10 = sshll.u32 %s381_s14, 4 }
  0xaa   : > { %s384_s8 = scalar_lea.vmem %s8116_s2, %s5290_s10 }
  0xab   : > { %v390_v0 = vld [vmem:[%s384_s8] sm:$0xff] (!%p5094_p2)  ;;  %v391_v1 = vld [vmem:[%s384_s8 + $0x8] sm:$0xff] (!%p5094_p2) }
  0xac   : > { %393 = vst.msk [vmem:[#allocation2] sm:$0xff] (!%p5094_p2), %vm392_vm0, %v390_v0  ;;  %394 = vst.msk [vmem:[#allocation2 + $0x8] sm:$0xff] (!%p5094_p2), %vm392_vm0, %v391_v1 }
  0xaf PF: > { %s8161_s3 = sld [smem:[#allocation21_spill]]  ;;  %vm449_vm1 = vcmask 130048   ;;  %v409_v7 = vld [vmem:[#allocation8 + $0x20] sm:$0xff]  ;;  %v410_v8 = vld [vmem:[#allocation8 + $0x28] sm:$0xff]  ;;  %v411_v9 = vld [vmem:[#allocation8 + $0x30] sm:$0xff]  ;;  %s7038_s20 = smov 32  }
  0xb0   : > { %v7384_v11 = vpack.c.bf16 %v410_v8, %v409_v7  ;;  %v412_v12 = vld [vmem:[#allocation8 + $0x38] sm:$0xff]  ;;  %v405_v21 = vld [vmem:[#allocation8] sm:$0xff]  ;;  %v406_v22 = vld [vmem:[#allocation8 + $0x8] sm:$0xff]  ;;  %vm595_vm2 = vcmask 261120   ;;  %s7039_s18 = smov 96   ;;  %s4923_s21 = sshll.u32 %s7356_s17, 4  ;;  %s8054_s21 = int_to_ptr.vmem [resolvable:$true] %s4923_s21 }
  0xb1   : > { %v7386_v13 = vpack.c.bf16 %v412_v12, %v411_v9  ;;  %v7445_v23 = vpack.c.bf16 %v406_v22, %v405_v21  ;;  %v407_v26 = vld [vmem:[#allocation8 + $0x10] sm:$0xff]  ;;  %v408_v27 = vld [vmem:[#allocation8 + $0x18] sm:$0xff]  ;;  %v413_v31 = vld [vmem:[#allocation8 + $0x40] sm:$0xff]  ;;  %s8163_s14 = sld [smem:[#allocation24_spill]] }
  0xb2   : > { %v7452_v30 = vpack.c.bf16 %v408_v27, %v407_v26  ;;  %v414_v32 = vld [vmem:[#allocation8 + $0x48] sm:$0xff]  ;;  %v415_v36 = vld [vmem:[#allocation8 + $0x50] sm:$0xff]  ;;  %v416_v37 = vld [vmem:[#allocation8 + $0x58] sm:$0xff] }
  0xb3   : > { %v7359_v2 = vld [vmem:[#allocation2] sm:$0xff]  ;;  %v7361_v3 = vld [vmem:[#allocation2 + $0x8] sm:$0xff]  ;;  %v7459_v34 = vpack.c.bf16 %v414_v32, %v413_v31  ;;  %v7463_v39 = vpack.c.bf16 %v416_v37, %v415_v36  ;;  %v417_v41 = vld [vmem:[#allocation8 + $0x60] sm:$0xff] }
  0xb4   : > { %v6220_v5 = vpack.c.bf16 %v7361_v3, %v7359_v2  ;;  %1557 = vrot.lane.b32.xlu0 %v7359_v2, %s7038_s20  ;;  %v418_v42 = vld [vmem:[#allocation8 + $0x68] sm:$0xff]  ;;  %v419_v46 = vld [vmem:[#allocation8 + $0x70] sm:$0xff]  ;;  %v420_v47 = vld [vmem:[#allocation8 + $0x78] sm:$0xff] }
  0xb5   : > { %v7366_v4 = vld [vmem:[%s8161_s3] sm:$0xff]  ;;  %v7377_v6 = vld [vmem:[%s8161_s3 + $0x8] sm:$0xff]  ;;  %v7382_v10 = vld [vmem:[%s8161_s3 + $0x10] sm:$0xff]  ;;  %v7469_v44 = vpack.c.bf16 %v418_v42, %v417_v41  ;;  %v7473_v48 = vpack.c.bf16 %v420_v47, %v419_v46 }
  0xb6   : > { %5632 = vmatprep.mubr.msk.f32.mxu1 %vm449_vm1, %v7366_v4  ;;  %5706 = vmatprep.mubr.msk.f32.mxu0 %vm449_vm1, %v7366_v4  ;;  %v7396_v14 = vld [vmem:[%s8161_s3 + $0x18] sm:$0xff]  ;;  %v7402_v15 = vld [vmem:[%s8161_s3 + $0x20] sm:$0xff]  ;;  %v7412_v16 = vld [vmem:[%s8161_s3 + $0x28] sm:$0xff] }
  0xb7   : > { %6221 = vmatprep.subr.bf16.mxu1 %v6220_v5  ;;  %v7418_v17 = vld [vmem:[%s8161_s3 + $0x30] sm:$0xff]  ;;  %v7427_v18 = vld [vmem:[%s8161_s3 + $0x38] sm:$0xff]  ;;  %v7432_v19 = vld [vmem:[%s8161_s3 + $0x40] sm:$0xff] }
  0xb8   : > { %6223 = vmatpush3.bf16.msra.mxu1 %v6220_v5  ;;  %v7441_v20 = vld [vmem:[%s8161_s3 + $0x48] sm:$0xff]  ;;  %1559 = vrot.lane.b32.xlu0 %v7361_v3, %s7038_s20  ;;  %v421_v49 = vld [vmem:[#allocation8 + $0x80] sm:$0xff]  ;;  %v422_v50 = vld [vmem:[#allocation8 + $0x88] sm:$0xff] }
  0xb9   : > { %6225 = vmatprep.subr.bf16.mxu1 %v7384_v11  ;;  %v7479_v51 = vpack.c.bf16 %v422_v50, %v421_v49  ;;  %v423_v52 = vld [vmem:[#allocation8 + $0x90] sm:$0xff]  ;;  %v424_v53 = vld [vmem:[#allocation8 + $0x98] sm:$0xff]  ;;  %v448_v55 = vld [vmem:[%s7330_s30 + $0x8] sm:$0xff] }
  0xba   : > { %v7483_v54 = vpack.c.bf16 %v424_v53, %v423_v52  ;;  %v447_v56 = vld [vmem:[%s7330_s30] sm:$0xff]  ;;  %v430_v21 = vld [vmem:[#allocation9 + $0x28] sm:$0xff]  ;;  %v431_v26 = vld [vmem:[#allocation9 + $0x30] sm:$0xff] }
  0xbb   : > { %5633 = vmatmul.mubr.msk.f32.vlgmr.msra.gmra.mrb[0].mxu1 %vm449_vm1, %v7377_v6  ;;  %v429_v12 = vld [vmem:[#allocation9 + $0x20] sm:$0xff]  ;;  %v432_v27 = vld [vmem:[#allocation9 + $0x38] sm:$0xff]  ;;  %v434_v41 = vld [vmem:[#allocation9 + $0x48] sm:$0xff] }
  0xbc   : > { %5635 = vmatprep.mubr.msk.f32.mxu1 %vm449_vm1, %v7382_v10  ;;  %6227 = vmatpush3.bf16.msra.mxu1 %v7384_v11  ;;  %v435_v46 = vld [vmem:[#allocation9 + $0x50] sm:$0xff]  ;;  %v436_v47 = vld [vmem:[#allocation9 + $0x58] sm:$0xff]  ;;  %v437_v53 = vld [vmem:[#allocation9 + $0x60] sm:$0xff] }
  0xbd   : > { %6229 = vmatprep.subr.bf16.mxu1 %v7386_v13  ;;  %v7543_v50 = vpack.c.bf16 %v436_v47, %v435_v46 }
  0xbf   : > { %5636 = vmatmul.mubr.msk.f32.gmra.mrb[2].mxu1 %vm449_vm1, %v7396_v14 }
  0xc0   : > { %5638 = vmatprep.mubr.msk.f32.mxu1 %vm449_vm1, %v7402_v15  ;;  %6231 = vmatpush3.bf16.msra.mxu1 %v7386_v13 }
  0xc1   : > { %6233 = vmatprep.subr.bf16.mxu1 %v7445_v23 }
  0xc3   : > { %5639 = vmatmul.mubr.msk.f32.gmra.mrb[4].mxu1 %vm449_vm1, %v7412_v16 }
  0xc4   : > { %5641 = vmatprep.mubr.msk.f32.mxu1 %vm449_vm1, %v7418_v17 }
  0xc7   : > { %5642 = vmatmul.mubr.msk.f32.gmra.mrb[6].mxu1 %vm449_vm1, %v7427_v18 }
  0xc8   : > { %5644 = vmatprep.mubr.msk.f32.mxu1 %vm449_vm1, %v7432_v19 }
  0xcb   : > { %5645 = vmatmul.mubr.msk.f32.gmra.mrb[8].mxu1 %vm449_vm1, %v7441_v20 }
 0x18e   : > { %v5634_v24 = vpop.f32.mrb[0].mxu1 }
 0x18f   : > { %v546_v25 = vpop.f32.mrb[1].mxu1 }
 0x192   : > { %v5637_v28 = vpop.f32.mrb[2].mxu1 }
 0x193   : > { %v556_v29 = vpop.f32.mrb[3].mxu1 }
 0x194   : > { %5655 = vmatprep.mubr.msk.f32.mxu1 %vm595_vm2, %v556_v29 }
 0x195   : > { %5656 = vmatmul.mubr.msk.f32.vlgmr.msra.gmra.mrb[10].mxu1 %vm595_vm2, %v5637_v28  ;;  %v7506_v28 = vpack.c.bf16 %v432_v27, %v431_v26 }
 0x196   : > { %6235 = vmatpush3.bf16.msra.mxu1 %v7445_v23  ;;  %5666 = vmatprep.mubr.msk.f32.mxu1 %vm595_vm2, %v546_v25  ;;  %v5640_v33 = vpop.f32.mrb[4].mxu1  ;;  %v7503_v25 = vpack.c.bf16 %v430_v21, %v429_v12  ;;  %v1021_v12 = vld [vmem:[%s7337_s13] sm:$0xff] }
 0x197   : > { %6237 = vmatprep.subr.bf16.mxu1 %v7452_v30  ;;  %v566_v35 = vpop.f32.mrb[5].mxu1 }
 0x19a   : > { %6239 = vmatpush3.bf16.msra.mxu1 %v7452_v30  ;;  %v5643_v38 = vpop.f32.mrb[6].mxu1 }
 0x19b   : > { %6241 = vmatprep.subr.bf16.mxu1 %v7459_v34  ;;  %v576_v40 = vpop.f32.mrb[7].mxu1 }
 0x19d   : > { %5667 = vmatmul.mubr.msk.f32.vlgmr.msra.gmra.mrb[10].mxu1 %vm595_vm2, %v5634_v24 }
 0x19e   : > { %6243 = vmatpush3.bf16.msra.mxu1 %v7459_v34  ;;  %5677 = vmatprep.mubr.msk.f32.mxu1 %vm595_vm2, %v566_v35  ;;  %v5646_v43 = vpop.f32.mrb[8].mxu1  ;;  %v428_v35 = vld [vmem:[#allocation9 + $0x18] sm:$0xff] }
 0x19f   : > { %6245 = vmatprep.subr.bf16.mxu1 %v7463_v39  ;;  %v586_v45 = vpop.f32.mrb[9].mxu1 }
 0x1a2   : > { %6247 = vmatpush3.bf16.msra.mxu1 %v7463_v39 }
 0x1a3   : > { %6249 = vmatprep.subr.bf16.mxu1 %v7469_v44 }
 0x1a5   : > { %5678 = vmatmul.mubr.msk.f32.vlgmr.msra.gmra.mrb[10].mxu1 %vm595_vm2, %v5640_v33  ;;  %v427_v33 = vld [vmem:[#allocation9 + $0x10] sm:$0xff] }
 0x1a6   : > { %6251 = vmatpush3.bf16.msra.mxu1 %v7469_v44  ;;  %5688 = vmatprep.mubr.msk.f32.mxu1 %vm595_vm2, %v576_v40  ;;  %v433_v40 = vld [vmem:[#allocation9 + $0x40] sm:$0xff] }
 0x1a7   : > { %6253 = vmatprep.subr.bf16.mxu1 %v7473_v48 }
 0x1aa   : > { %6255 = vmatpush3.bf16.msra.mxu1 %v7473_v48 }
 0x1ab   : > { %6257 = vmatprep.subr.bf16.mxu1 %v7479_v51 }
 0x1ad   : > { %5689 = vmatmul.mubr.msk.f32.vlgmr.msra.gmra.mrb[10].mxu1 %vm595_vm2, %v5643_v38  ;;  %v7532_v38 = vpack.c.bf16 %v428_v35, %v427_v33 }
 0x1ae   : > { %6259 = vmatpush3.bf16.msra.mxu1 %v7479_v51  ;;  %5699 = vmatprep.mubr.msk.f32.mxu1 %vm595_vm2, %v586_v45 }
 0x1af   : > { %6261 = vmatprep.subr.bf16.mxu1 %v7483_v54 }
 0x1b2   : > { %6263 = vmatpush3.bf16.msra.mxu1 %v7483_v54 }
 0x1b5   : > { %5700 = vmatmul.mubr.msk.f32.vlgmr.msra.gmra.mrb[10].mxu1 %vm595_vm2, %v5646_v43  ;;  %v7539_v43 = vpack.c.bf16 %v434_v41, %v433_v40 }
 0x1b6   : > { %5780 = vmatprep.mubr.msk.f32.mxu1 %vm449_vm1, %v7366_v4 }
 0x288   : > { %v5701_v57 = vpop.f32.mrb[10].mxu1 }
 0x289   : > { %v1008_v58 = vadd.f32 %v5701_v57, %v448_v55  ;;  %v996_v59 = vpop.f32.mrb[11].mxu1  ;;  %v438_v55 = vld [vmem:[#allocation9 + $0x68] sm:$0xff] }
 0x28a   : > { %v1007_v60 = vadd.f32 %v996_v59, %v447_v56  ;;  %v7549_v57 = vpack.c.bf16 %v438_v55, %v437_v53  ;;  %v439_v59 = vld [vmem:[#allocation9 + $0x70] sm:$0xff] }
 0x28b   : > { %v5116_v61 = vmul.f32 -1.442695, %v1008_v58 }
 0x28c   : > { %v5115_v62 = vmul.f32 -1.442695, %v1007_v60  ;;  %v440_v60 = vld [vmem:[#allocation9 + $0x78] sm:$0xff] }
 0x28d   : > { %6746 = vpow2.f32 %v5116_v61  ;;  %v7553_v61 = vpack.c.bf16 %v440_v60, %v439_v59 }
 0x28e   : > { %6748 = vpow2.f32 %v5115_v62  ;;  %v441_v62 = vld [vmem:[#allocation9 + $0x80] sm:$0xff] }
 0x297   : > { %v6747_v63 = vpop.eup %6746 }
 0x298   : > { %v6749_v0 = vpop.eup %6748  ;;  %v1016_v1 = vadd.f32 1.0, %v6747_v63  ;;  %v442_v63 = vld [vmem:[#allocation9 + $0x88] sm:$0xff] }
 0x299   : > { %v1015_v5 = vadd.f32 1.0, %v6749_v0  ;;  %v7559_v0 = vpack.c.bf16 %v442_v63, %v441_v62 }
 0x29a   : > { %6750 = vrcp.f32 %v1016_v1  ;;  %v443_v1 = vld [vmem:[#allocation9 + $0x90] sm:$0xff] }
 0x29b   : > { %6752 = vrcp.f32 %v1015_v5  ;;  %v444_v5 = vld [vmem:[#allocation9 + $0x98] sm:$0xff] }
 0x2a4   : > { %v7495_v7 = vpop.eup %6750 }
 0x2a5   : > { %v7497_v8 = vpop.eup %6752  ;;  %v1024_v9 = vmul.f32 %v7495_v7, %v7361_v3  ;;  %v426_v3 = vld [vmem:[#allocation9 + $0x8] sm:$0xff]  ;;  %v1566_v41 = vsub.f32 1.0, %v7495_v7 }
 0x2a6   : > { %v1023_v22 = vmul.f32 %v7497_v8, %v7359_v2  ;;  %v425_v2 = vld [vmem:[#allocation9] sm:$0xff] }
 0x2a7   : > { %v7529_v29 = vpack.c.bf16 %v426_v3, %v425_v2 }
 0x2a8   : > { %v6264_v24 = vpack.c.bf16 %v1024_v9, %v1023_v22  ;;  %v7563_v9 = vpack.c.bf16 %v444_v5, %v443_v1  ;;  %v1022_v22 = vld [vmem:[%s7337_s13 + $0x8] sm:$0xff]  ;;  %v5138_v5 = vld [vmem:[%s7330_s30 + $0x18] sm:$0xff] }
 0x2aa   : > { %6265 = vmatprep.subr.bf16.mxu0 %v6264_v24 }
 0x2ab   : > { %6267 = vmatpush3.bf16.msra.mxu0 %v6264_v24 }
 0x2ac   : > { %6269 = vmatprep.subr.bf16.mxu0 %v7503_v25 }
 0x2ae   : > { %5707 = vmatmul.mubr.msk.f32.vlgmr.msra.gmra.mrb[0].mxu0 %vm449_vm1, %v7377_v6 }
 0x2af   : > { %5709 = vmatprep.mubr.msk.f32.mxu0 %vm449_vm1, %v7382_v10  ;;  %6271 = vmatpush3.bf16.msra.mxu0 %v7503_v25 }
 0x2b0   : > { %6273 = vmatprep.subr.bf16.mxu0 %v7506_v28 }
 0x2b2   : > { %5710 = vmatmul.mubr.msk.f32.gmra.mrb[2].mxu0 %vm449_vm1, %v7396_v14 }
 0x2b3   : > { %5712 = vmatprep.mubr.msk.f32.mxu0 %vm449_vm1, %v7402_v15  ;;  %6275 = vmatpush3.bf16.msra.mxu0 %v7506_v28 }
 0x2b4   : > { %6277 = vmatprep.subr.bf16.mxu0 %v7529_v29 }
 0x2b6   : > { %5713 = vmatmul.mubr.msk.f32.gmra.mrb[4].mxu0 %vm449_vm1, %v7412_v16 }
 0x2b7   : > { %5715 = vmatprep.mubr.msk.f32.mxu0 %vm449_vm1, %v7418_v17 }
 0x2ba   : > { %5716 = vmatmul.mubr.msk.f32.gmra.mrb[6].mxu0 %vm449_vm1, %v7427_v18 }
 0x2bb   : > { %5718 = vmatprep.mubr.msk.f32.mxu0 %vm449_vm1, %v7432_v19 }
 0x2be   : > { %5719 = vmatmul.mubr.msk.f32.gmra.mrb[8].mxu0 %vm449_vm1, %v7441_v20 }
 0x381   : > { %v5708_v31 = vpop.f32.mrb[0].mxu0 }
 0x382   : > { %v1091_v32 = vpop.f32.mrb[1].mxu0 }
 0x385   : > { %v5711_v36 = vpop.f32.mrb[2].mxu0 }
 0x386   : > { %v1101_v37 = vpop.f32.mrb[3].mxu0 }
 0x387   : > { %5729 = vmatprep.mubr.msk.f32.mxu0 %vm595_vm2, %v1101_v37 }
 0x388   : > { %5730 = vmatmul.mubr.msk.f32.vlgmr.msra.gmra.mrb[10].mxu0 %vm595_vm2, %v5711_v36 }
 0x389   : > { %6279 = vmatpush3.bf16.msra.mxu0 %v7529_v29  ;;  %5740 = vmatprep.mubr.msk.f32.mxu0 %vm595_vm2, %v1091_v32  ;;  %v5714_v42 = vpop.f32.mrb[4].mxu0  ;;  %v1565_v32 = vsub.f32 1.0, %v7497_v8 }
 0x38a   : > { %6281 = vmatprep.subr.bf16.mxu0 %v7532_v38  ;;  %v1111_v45 = vpop.f32.mrb[5].mxu0 }
 0x38d   : > { %6283 = vmatpush3.bf16.msra.mxu0 %v7532_v38  ;;  %v5717_v49 = vpop.f32.mrb[6].mxu0 }
 0x38e   : > { %6285 = vmatprep.subr.bf16.mxu0 %v7539_v43  ;;  %v1121_v52 = vpop.f32.mrb[7].mxu0 }
 0x390   : > { %5741 = vmatmul.mubr.msk.f32.vlgmr.msra.gmra.mrb[10].mxu0 %vm595_vm2, %v5708_v31  ;;  %v1558_v31 = vpop.permute.xlu0 %1557 }
 0x391   : > { %6287 = vmatpush3.bf16.msra.mxu0 %v7539_v43  ;;  %5751 = vmatprep.mubr.msk.f32.mxu0 %vm595_vm2, %v1111_v45  ;;  %v5720_v56 = vpop.f32.mrb[8].mxu0  ;;  %v1563_v35 = vmul.f32 %v7497_v8, %v1558_v31 }
 0x392   : > { %6289 = vmatprep.subr.bf16.mxu0 %v7543_v50  ;;  %v1131_v58 = vpop.f32.mrb[9].mxu0 }
 0x394   : > { %v1560_v37 = vpop.permute.xlu0 %1559 }
 0x395   : > { %6291 = vmatpush3.bf16.msra.mxu0 %v7543_v50  ;;  %v1564_v45 = vmul.f32 %v7495_v7, %v1560_v37 }
 0x396   : > { %6293 = vmatprep.subr.bf16.mxu0 %v7549_v57 }
 0x398   : > { %5752 = vmatmul.mubr.msk.f32.vlgmr.msra.gmra.mrb[10].mxu0 %vm595_vm2, %v5714_v42 }
 0x399   : > { %6295 = vmatpush3.bf16.msra.mxu0 %v7549_v57  ;;  %5762 = vmatprep.mubr.msk.f32.mxu0 %vm595_vm2, %v1121_v52 }
 0x39a   : > { %6297 = vmatprep.subr.bf16.mxu0 %v7553_v61 }
 0x39d   : > { %6299 = vmatpush3.bf16.msra.mxu0 %v7553_v61 }
 0x39e   : > { %6301 = vmatprep.subr.bf16.mxu0 %v7559_v0 }
 0x3a0   : > { %5763 = vmatmul.mubr.msk.f32.vlgmr.msra.gmra.mrb[10].mxu0 %vm595_vm2, %v5717_v49 }
 0x3a1   : > { %6303 = vmatpush3.bf16.msra.mxu0 %v7559_v0  ;;  %5773 = vmatprep.mubr.msk.f32.mxu0 %vm595_vm2, %v1131_v58 }
 0x3a2   : > { %6305 = vmatprep.subr.bf16.mxu0 %v7563_v9 }
 0x3a5   : > { %6307 = vmatpush3.bf16.msra.mxu0 %v7563_v9 }
 0x3a8   : > { %5774 = vmatmul.mubr.msk.f32.vlgmr.msra.gmra.mrb[10].mxu0 %vm595_vm2, %v5720_v56 }
 0x3a9   : > { %5854 = vmatprep.mubr.msk.f32.mxu0 %vm449_vm1, %v7366_v4 }
 0x47b   : > { %v5775_v21 = vpop.f32.mrb[10].mxu0 }
 0x47c   : > { %v1540_v24 = vpop.f32.mrb[11].mxu0  ;;  %v1552_v27 = vadd.f32 %v5775_v21, %v1022_v22 }
 0x47d   : > { %v1551_v26 = vadd.f32 %v1540_v24, %v1021_v12  ;;  %v5137_v12 = vld [vmem:[%s7330_s30 + $0x10] sm:$0xff] }
 0x47f   : > { %6754 = vtanh.f32 %v1551_v26 }
 0x480   : > { %6756 = vtanh.f32 %v1552_v27 }
 0x489   : > { %v6755_v2 = vpop.eup %6754 }
 0x48a   : > { %1569 = vrot.lane.b32.xlu1 %v6755_v2, %s7038_s20  ;;  %v6757_v3 = vpop.eup %6756 }
 0x48e   : > { %1571 = vrot.lane.b32.xlu1 %v6757_v3, %s7038_s20 }
 0x4fc   : > { %v1570_v33 = vpop.permute.xlu1 %1569 }
 0x4fd   : > { %v1575_v36 = vmul.f32 %v1570_v33, %v1565_v32 }
 0x4ff   : > { %v7579_v40 = vadd.f32 %v1575_v36, %v1563_v35 }
 0x500   : > { %v1572_v42 = vpop.permute.xlu1 %1571 }
 0x501   : > { %v1576_v46 = vmul.f32 %v1572_v42, %v1566_v41  ;;  %1581 = vrot.lane.b32.xlu0 %v7579_v40, %s7039_s18 }
 0x503   : > { %v7585_v47 = vadd.f32 %v1576_v46, %v1564_v45 }
 0x505   : > { %1583 = vrot.lane.b32.xlu1 %v7585_v47, %s7039_s18 }
 0x573   : > { %v7589_v8 = vpop.permute.xlu0 %1581 }
 0x574   : > { %1587 = vst.msk [vmem:[%s7356_s17] sm:$0xff] %vm595_vm2, %v7589_v8 }
 0x577   : > { %v7594_v49 = vpop.permute.xlu1 %1583 }
 0x578   : > { %1588 = vst.msk [vmem:[%s7356_s17 + $0x8] sm:$0xff] %vm595_vm2, %v7594_v49  ;;  %v6308_v7 = vpack.c.bf16 %v7594_v49, %v7589_v8 }
 0x57a   : > { %6309 = vmatprep.subr.bf16.mxu1 %v6308_v7 }
 0x57b   : > { %6311 = vmatpush3.bf16.msra.mxu1 %v6308_v7 }
 0x57c   : > { %6313 = vmatprep.subr.bf16.mxu1 %v7384_v11 }
 0x57e   : > { %5781 = vmatmul.mubr.msk.f32.vlgmr.msra.gmra.mrb[12].mxu1 %vm449_vm1, %v7377_v6 }
 0x57f   : > { %5783 = vmatprep.mubr.msk.f32.mxu1 %vm449_vm1, %v7382_v10  ;;  %6315 = vmatpush3.bf16.msra.mxu1 %v7384_v11 }
 0x580   : > { %6317 = vmatprep.subr.bf16.mxu1 %v7386_v13 }
 0x582   : > { %5784 = vmatmul.mubr.msk.f32.gmra.mrb[14].mxu1 %vm449_vm1, %v7396_v14 }
 0x583   : > { %5786 = vmatprep.mubr.msk.f32.mxu1 %vm449_vm1, %v7402_v15  ;;  %6319 = vmatpush3.bf16.msra.mxu1 %v7386_v13 }
 0x584   : > { %6321 = vmatprep.subr.bf16.mxu1 %v7445_v23 }
 0x586   : > { %5787 = vmatmul.mubr.msk.f32.gmra.mrb[16].mxu1 %vm449_vm1, %v7412_v16 }
 0x587   : > { %5789 = vmatprep.mubr.msk.f32.mxu1 %vm449_vm1, %v7418_v17 }
 0x58a   : > { %5790 = vmatmul.mubr.msk.f32.gmra.mrb[18].mxu1 %vm449_vm1, %v7427_v18 }
 0x58b   : > { %5792 = vmatprep.mubr.msk.f32.mxu1 %vm449_vm1, %v7432_v19 }
 0x58e   : > { %5793 = vmatmul.mubr.msk.f32.gmra.mrb[20].mxu1 %vm449_vm1, %v7441_v20 }
 0x651   : > { %v5782_v52 = vpop.f32.mrb[12].mxu1 }
 0x652   : > { %v1658_v53 = vpop.f32.mrb[13].mxu1 }
 0x655   : > { %v5785_v55 = vpop.f32.mrb[14].mxu1 }
 0x656   : > { %v1668_v56 = vpop.f32.mrb[15].mxu1 }
 0x657   : > { %5803 = vmatprep.mubr.msk.f32.mxu1 %vm595_vm2, %v1668_v56 }
 0x658   : > { %5804 = vmatmul.mubr.msk.f32.vlgmr.msra.gmra.mrb[22].mxu1 %vm595_vm2, %v5785_v55 }
 0x659   : > { %6323 = vmatpush3.bf16.msra.mxu1 %v7445_v23  ;;  %5814 = vmatprep.mubr.msk.f32.mxu1 %vm595_vm2, %v1658_v53  ;;  %v5788_v58 = vpop.f32.mrb[16].mxu1 }
 0x65a   : > { %6325 = vmatprep.subr.bf16.mxu1 %v7452_v30  ;;  %v1678_v59 = vpop.f32.mrb[17].mxu1 }
 0x65d   : > { %6327 = vmatpush3.bf16.msra.mxu1 %v7452_v30  ;;  %v5791_v60 = vpop.f32.mrb[18].mxu1 }
 0x65e   : > { %6329 = vmatprep.subr.bf16.mxu1 %v7459_v34  ;;  %v1688_v62 = vpop.f32.mrb[19].mxu1 }
 0x660   : > { %5815 = vmatmul.mubr.msk.f32.vlgmr.msra.gmra.mrb[22].mxu1 %vm595_vm2, %v5782_v52 }
 0x661   : > { %6331 = vmatpush3.bf16.msra.mxu1 %v7459_v34  ;;  %5825 = vmatprep.mubr.msk.f32.mxu1 %vm595_vm2, %v1678_v59  ;;  %v5794_v63 = vpop.f32.mrb[20].mxu1  ;;  %v5162_v59 = vld [vmem:[%s7337_s13 + $0x18] sm:$0xff] }
 0x662   : > { %6333 = vmatprep.subr.bf16.mxu1 %v7463_v39  ;;  %v1698_v1 = vpop.f32.mrb[21].mxu1 }
 0x665   : > { %6335 = vmatpush3.bf16.msra.mxu1 %v7463_v39 }
 0x666   : > { %6337 = vmatprep.subr.bf16.mxu1 %v7469_v44 }
 0x668   : > { %5826 = vmatmul.mubr.msk.f32.vlgmr.msra.gmra.mrb[22].mxu1 %vm595_vm2, %v5788_v58 }
 0x669   : > { %6339 = vmatpush3.bf16.msra.mxu1 %v7469_v44  ;;  %5836 = vmatprep.mubr.msk.f32.mxu1 %vm595_vm2, %v1688_v62 }
 0x66a   : > { %6341 = vmatprep.subr.bf16.mxu1 %v7473_v48 }
 0x66d   : > { %6343 = vmatpush3.bf16.msra.mxu1 %v7473_v48 }
 0x66e   : > { %6345 = vmatprep.subr.bf16.mxu1 %v7479_v51 }
 0x670   : > { %5837 = vmatmul.mubr.msk.f32.vlgmr.msra.gmra.mrb[22].mxu1 %vm595_vm2, %v5791_v60  ;;  %v5161_v60 = vld [vmem:[%s7337_s13 + $0x10] sm:$0xff] }
 0x671   : > { %6347 = vmatpush3.bf16.msra.mxu1 %v7479_v51  ;;  %5847 = vmatprep.mubr.msk.f32.mxu1 %vm595_vm2, %v1698_v1 }
 0x672   : > { %6349 = vmatprep.subr.bf16.mxu1 %v7483_v54 }
 0x675   : > { %6351 = vmatpush3.bf16.msra.mxu1 %v7483_v54 }
 0x678   : > { %5848 = vmatmul.mubr.msk.f32.vlgmr.msra.gmra.mrb[22].mxu1 %vm595_vm2, %v5794_v63 }
 0x679   : > { %5928 = vmatprep.mubr.msk.f32.mxu1 %vm449_vm1, %v7366_v4 }
 0x74b   : > { %v5849_v21 = vpop.f32.mrb[22].mxu1 }
 0x74c   : > { %v2119_v22 = vadd.f32 %v5849_v21, %v5138_v5  ;;  %v2107_v24 = vpop.f32.mrb[23].mxu1 }
 0x74d   : > { %v2118_v26 = vadd.f32 %v5137_v12, %v2107_v24 }
 0x74e   : > { %v5160_v27 = vmul.f32 -1.442695, %v2119_v22 }
 0x74f   : > { %v5159_v2 = vmul.f32 -1.442695, %v2118_v26 }
 0x750   : > { %6758 = vpow2.f32 %v5160_v27 }
 0x751   : > { %6760 = vpow2.f32 %v5159_v2 }
 0x75a   : > { %v6759_v3 = vpop.eup %6758 }
 0x75b   : > { %v6761_v31 = vpop.eup %6760  ;;  %v2127_v32 = vadd.f32 1.0, %v6759_v3 }
 0x75c   : > { %v2126_v33 = vadd.f32 1.0, %v6761_v31 }
 0x75d   : > { %6762 = vrcp.f32 %v2127_v32 }
 0x75e   : > { %6764 = vrcp.f32 %v2126_v33 }
 0x767   : > { %v7653_v35 = vpop.eup %6762 }
 0x768   : > { %v7655_v36 = vpop.eup %6764  ;;  %v2136_v37 = vmul.f32 %v7653_v35, %v7594_v49  ;;  %v2670_v22 = vsub.f32 1.0, %v7653_v35  ;;  %v2668_v27 = vmul.f32 %v7653_v35, %v7585_v47 }
 0x769   : > { %v2135_v41 = vmul.f32 %v7655_v36, %v7589_v8  ;;  %v2669_v26 = vsub.f32 1.0, %v7655_v36  ;;  %v2667_v31 = vmul.f32 %v7655_v36, %v7579_v40 }
 0x76b   : > { %v6352_v42 = vpack.c.bf16 %v2136_v37, %v2135_v41 }
 0x76d   : > { %6353 = vmatprep.subr.bf16.mxu0 %v6352_v42 }
 0x76e   : > { %6355 = vmatpush3.bf16.msra.mxu0 %v6352_v42 }
 0x76f   : > { %6357 = vmatprep.subr.bf16.mxu0 %v7503_v25 }
 0x771   : > { %5855 = vmatmul.mubr.msk.f32.vlgmr.msra.gmra.mrb[12].mxu0 %vm449_vm1, %v7377_v6 }
 0x772   : > { %5857 = vmatprep.mubr.msk.f32.mxu0 %vm449_vm1, %v7382_v10  ;;  %6359 = vmatpush3.bf16.msra.mxu0 %v7503_v25 }
 0x773   : > { %6361 = vmatprep.subr.bf16.mxu0 %v7506_v28 }
 0x775   : > { %5858 = vmatmul.mubr.msk.f32.gmra.mrb[14].mxu0 %vm449_vm1, %v7396_v14 }
 0x776   : > { %5860 = vmatprep.mubr.msk.f32.mxu0 %vm449_vm1, %v7402_v15  ;;  %6363 = vmatpush3.bf16.msra.mxu0 %v7506_v28 }
 0x777   : > { %6365 = vmatprep.subr.bf16.mxu0 %v7529_v29 }
 0x779   : > { %5861 = vmatmul.mubr.msk.f32.gmra.mrb[16].mxu0 %vm449_vm1, %v7412_v16 }
 0x77a   : > { %5863 = vmatprep.mubr.msk.f32.mxu0 %vm449_vm1, %v7418_v17 }
 0x77d   : > { %5864 = vmatmul.mubr.msk.f32.gmra.mrb[18].mxu0 %vm449_vm1, %v7427_v18 }
 0x77e   : > { %5866 = vmatprep.mubr.msk.f32.mxu0 %vm449_vm1, %v7432_v19 }
 0x781   : > { %5867 = vmatmul.mubr.msk.f32.gmra.mrb[20].mxu0 %vm449_vm1, %v7441_v20 }
 0x844   : > { %v5856_v45 = vpop.f32.mrb[12].mxu0 }
 0x845   : > { %v2203_v46 = vpop.f32.mrb[13].mxu0 }
 0x848   : > { %v5859_v8 = vpop.f32.mrb[14].mxu0 }
 0x849   : > { %v2213_v49 = vpop.f32.mrb[15].mxu0 }
 0x84a   : > { %5877 = vmatprep.mubr.msk.f32.mxu0 %vm595_vm2, %v2213_v49 }
 0x84b   : > { %5878 = vmatmul.mubr.msk.f32.vlgmr.msra.gmra.mrb[22].mxu0 %vm595_vm2, %v5859_v8 }
 0x84c   : > { %6367 = vmatpush3.bf16.msra.mxu0 %v7529_v29  ;;  %5888 = vmatprep.mubr.msk.f32.mxu0 %vm595_vm2, %v2203_v46  ;;  %v5862_v7 = vpop.f32.mrb[16].mxu0 }
 0x84d   : > { %6369 = vmatprep.subr.bf16.mxu0 %v7532_v38  ;;  %v2223_v52 = vpop.f32.mrb[17].mxu0 }
 0x850   : > { %6371 = vmatpush3.bf16.msra.mxu0 %v7532_v38  ;;  %v5865_v53 = vpop.f32.mrb[18].mxu0 }
 0x851   : > { %6373 = vmatprep.subr.bf16.mxu0 %v7539_v43  ;;  %v2233_v55 = vpop.f32.mrb[19].mxu0 }
 0x853   : > { %5889 = vmatmul.mubr.msk.f32.vlgmr.msra.gmra.mrb[22].mxu0 %vm595_vm2, %v5856_v45 }
 0x854   : > { %6375 = vmatpush3.bf16.msra.mxu0 %v7539_v43  ;;  %5899 = vmatprep.mubr.msk.f32.mxu0 %vm595_vm2, %v2223_v52  ;;  %v5868_v56 = vpop.f32.mrb[20].mxu0 }
 0x855   : > { %6377 = vmatprep.subr.bf16.mxu0 %v7543_v50  ;;  %v2243_v58 = vpop.f32.mrb[21].mxu0 }
 0x858   : > { %6379 = vmatpush3.bf16.msra.mxu0 %v7543_v50 }
 0x859   : > { %6381 = vmatprep.subr.bf16.mxu0 %v7549_v57 }
 0x85b   : > { %5900 = vmatmul.mubr.msk.f32.vlgmr.msra.gmra.mrb[22].mxu0 %vm595_vm2, %v5862_v7 }
 0x85c   : > { %6383 = vmatpush3.bf16.msra.mxu0 %v7549_v57  ;;  %5910 = vmatprep.mubr.msk.f32.mxu0 %vm595_vm2, %v2233_v55  ;;  %v5186_v55 = vld [vmem:[%s7330_s30 + $0x28] sm:$0xff] }
 0x85d   : > { %6385 = vmatprep.subr.bf16.mxu0 %v7553_v61 }
 0x860   : > { %6387 = vmatpush3.bf16.msra.mxu0 %v7553_v61 }
 0x861   : > { %6389 = vmatprep.subr.bf16.mxu0 %v7559_v0 }
 0x863   : > { %5911 = vmatmul.mubr.msk.f32.vlgmr.msra.gmra.mrb[22].mxu0 %vm595_vm2, %v5865_v53 }
 0x864   : > { %6391 = vmatpush3.bf16.msra.mxu0 %v7559_v0  ;;  %5921 = vmatprep.mubr.msk.f32.mxu0 %vm595_vm2, %v2243_v58 }
 0x865   : > { %6393 = vmatprep.subr.bf16.mxu0 %v7563_v9 }
 0x868   : > { %6395 = vmatpush3.bf16.msra.mxu0 %v7563_v9 }
 0x86b   : > { %5922 = vmatmul.mubr.msk.f32.vlgmr.msra.gmra.mrb[22].mxu0 %vm595_vm2, %v5868_v56  ;;  %v5185_v56 = vld [vmem:[%s7330_s30 + $0x20] sm:$0xff] }
 0x86c   : > { %6002 = vmatprep.mubr.msk.f32.mxu0 %vm449_vm1, %v7366_v4 }
 0x93e   : > { %v5923_v62 = vpop.f32.mrb[22].mxu0 }
 0x93f   : > { %v2664_v63 = vadd.f32 %v5923_v62, %v5162_v59  ;;  %v2652_v1 = vpop.f32.mrb[23].mxu0 }
 0x940   : > { %v2663_v5 = vadd.f32 %v5161_v60, %v2652_v1 }
 0x941   : > { %6766 = vtanh.f32 %v2664_v63 }
 0x942   : > { %6768 = vtanh.f32 %v2663_v5 }
 0x94b   : > { %v6767_v12 = vpop.eup %6766 }
 0x94c   : > { %v6769_v21 = vpop.eup %6768  ;;  %2675 = vrot.lane.b32.xlu1 %v6767_v12, %s7038_s20 }
 0x94d   : > { %2673 = vrot.lane.b32.xlu0 %v6769_v21, %s7038_s20 }
 0x9be   : > { %v2676_v24 = vpop.permute.xlu1 %2675 }
 0x9bf   : > { %v2680_v2 = vmul.f32 %v2676_v24, %v2670_v22  ;;  %v2674_v3 = vpop.permute.xlu0 %2673 }
 0x9c0   : > { %v2679_v32 = vmul.f32 %v2674_v3, %v2669_v26 }
 0x9c1   : > { %v7721_v33 = vadd.f32 %v2680_v2, %v2668_v27 }
 0x9c2   : > { %v7723_v37 = vadd.f32 %v2679_v32, %v2667_v31  ;;  %v6794_v31 = vld [vmem:[%s8161_s3] sm:$0xff]  ;;  %v5210_v32 = vld [vmem:[%s7337_s13 + $0x28] sm:$0xff] }
 0x9c3   : > { %2687 = vrot.lane.b32.xlu1 %v7721_v33, %s7039_s18 }
 0x9c4   : > { %2685 = vrot.lane.b32.xlu0 %v7723_v37, %s7039_s18 }
 0xa35   : > { %v7729_v41 = vpop.permute.xlu1 %2687 }
 0xa36   : > { %5184 = vst.msk [vmem:[%s7356_s17 + $0x18] sm:$0xff] %vm595_vm2, %v7729_v41  ;;  %v7734_v47 = vpop.permute.xlu0 %2685 }
 0xa37   : > { %5183 = vst.msk [vmem:[%s7356_s17 + $0x10] sm:$0xff] %vm595_vm2, %v7734_v47  ;;  %v6396_v40 = vpack.c.bf16 %v7729_v41, %v7734_v47 }
 0xa39   : > { %6397 = vmatprep.subr.bf16.mxu1 %v6396_v40 }
 0xa3a   : > { %6399 = vmatpush3.bf16.msra.mxu1 %v6396_v40 }
 0xa3b   : > { %6401 = vmatprep.subr.bf16.mxu1 %v7384_v11 }
 0xa3d   : > { %5929 = vmatmul.mubr.msk.f32.vlgmr.msra.gmra.mrb[24].mxu1 %vm449_vm1, %v7377_v6 }
 0xa3e   : > { %5931 = vmatprep.mubr.msk.f32.mxu1 %vm449_vm1, %v7382_v10  ;;  %6403 = vmatpush3.bf16.msra.mxu1 %v7384_v11 }
 0xa3f   : > { %6405 = vmatprep.subr.bf16.mxu1 %v7386_v13 }
 0xa41   : > { %5932 = vmatmul.mubr.msk.f32.gmra.mrb[26].mxu1 %vm449_vm1, %v7396_v14 }
 0xa42   : > { %5934 = vmatprep.mubr.msk.f32.mxu1 %vm449_vm1, %v7402_v15  ;;  %6407 = vmatpush3.bf16.msra.mxu1 %v7386_v13 }
 0xa43   : > { %6409 = vmatprep.subr.bf16.mxu1 %v7445_v23 }
 0xa45   : > { %5935 = vmatmul.mubr.msk.f32.gmra.mrb[28].mxu1 %vm449_vm1, %v7412_v16 }
 0xa46   : > { %5937 = vmatprep.mubr.msk.f32.mxu1 %vm449_vm1, %v7418_v17 }
 0xa49   : > { %5938 = vmatmul.mubr.msk.f32.gmra.mrb[30].mxu1 %vm449_vm1, %v7427_v18 }
 0xa4a   : > { %5940 = vmatprep.mubr.msk.f32.mxu1 %vm449_vm1, %v7432_v19 }
 0xa4d   : > { %5941 = vmatmul.mubr.msk.f32.gmra.mrb[32].mxu1 %vm449_vm1, %v7441_v20 }
 0xb10   : > { %v5930_v35 = vpop.f32.mrb[24].mxu1 }
 0xb11   : > { %v2763_v36 = vpop.f32.mrb[25].mxu1 }
 0xb14   : > { %v5933_v42 = vpop.f32.mrb[26].mxu1 }
 0xb15   : > { %v2773_v45 = vpop.f32.mrb[27].mxu1 }
 0xb16   : > { %5951 = vmatprep.mubr.msk.f32.mxu1 %vm595_vm2, %v2773_v45 }
 0xb17   : > { %5952 = vmatmul.mubr.msk.f32.vlgmr.msra.gmra.mrb[34].mxu1 %vm595_vm2, %v5933_v42 }
 0xb18   : > { %6411 = vmatpush3.bf16.msra.mxu1 %v7445_v23  ;;  %5962 = vmatprep.mubr.msk.f32.mxu1 %vm595_vm2, %v2763_v36  ;;  %v5936_v46 = vpop.f32.mrb[28].mxu1 }
 0xb19   : > { %6413 = vmatprep.subr.bf16.mxu1 %v7452_v30  ;;  %v2783_v8 = vpop.f32.mrb[29].mxu1 }
 0xb1c   : > { %6415 = vmatpush3.bf16.msra.mxu1 %v7452_v30  ;;  %v5939_v49 = vpop.f32.mrb[30].mxu1 }
 0xb1d   : > { %6417 = vmatprep.subr.bf16.mxu1 %v7459_v34  ;;  %v2793_v7 = vpop.f32.mrb[31].mxu1 }
 0xb1f   : > { %5963 = vmatmul.mubr.msk.f32.vlgmr.msra.gmra.mrb[34].mxu1 %vm595_vm2, %v5930_v35 }
 0xb20   : > { %6419 = vmatpush3.bf16.msra.mxu1 %v7459_v34  ;;  %5973 = vmatprep.mubr.msk.f32.mxu1 %vm595_vm2, %v2783_v8  ;;  %v5942_v52 = vpop.f32.mrb[32].mxu1 }
 0xb21   : > { %6421 = vmatprep.subr.bf16.mxu1 %v7463_v39  ;;  %v2803_v53 = vpop.f32.mrb[33].mxu1 }
 0xb24   : > { %6423 = vmatpush3.bf16.msra.mxu1 %v7463_v39 }
 0xb25   : > { %6425 = vmatprep.subr.bf16.mxu1 %v7469_v44 }
 0xb27   : > { %5974 = vmatmul.mubr.msk.f32.vlgmr.msra.gmra.mrb[34].mxu1 %vm595_vm2, %v5936_v46 }
 0xb28   : > { %6427 = vmatpush3.bf16.msra.mxu1 %v7469_v44  ;;  %5984 = vmatprep.mubr.msk.f32.mxu1 %vm595_vm2, %v2793_v7 }
 0xb29   : > { %6429 = vmatprep.subr.bf16.mxu1 %v7473_v48 }
 0xb2c   : > { %6431 = vmatpush3.bf16.msra.mxu1 %v7473_v48 }
 0xb2d   : > { %6433 = vmatprep.subr.bf16.mxu1 %v7479_v51 }
 0xb2f   : > { %5985 = vmatmul.mubr.msk.f32.vlgmr.msra.gmra.mrb[34].mxu1 %vm595_vm2, %v5939_v49 }
 0xb30   : > { %6435 = vmatpush3.bf16.msra.mxu1 %v7479_v51  ;;  %5995 = vmatprep.mubr.msk.f32.mxu1 %vm595_vm2, %v2803_v53 }
 0xb31   : > { %6437 = vmatprep.subr.bf16.mxu1 %v7483_v54 }
 0xb34   : > { %6439 = vmatpush3.bf16.msra.mxu1 %v7483_v54 }
 0xb37   : > { %5996 = vmatmul.mubr.msk.f32.vlgmr.msra.gmra.mrb[34].mxu1 %vm595_vm2, %v5942_v52 }
 0xb38   : > { %6076 = vmatprep.mubr.msk.f32.mxu1 %vm449_vm1, %v7366_v4 }
 0xc0a   : > { %v5997_v58 = vpop.f32.mrb[34].mxu1 }
 0xc0b   : > { %v3224_v59 = vadd.f32 %v5997_v58, %v5186_v55  ;;  %v3212_v60 = vpop.f32.mrb[35].mxu1 }
 0xc0c   : > { %v3223_v62 = vadd.f32 %v5185_v56, %v3212_v60 }
 0xc0d   : > { %v5208_v63 = vmul.f32 -1.442695, %v3224_v59 }
 0xc0e   : > { %v5207_v1 = vmul.f32 -1.442695, %v3223_v62  ;;  %v7887_v62 = vld [vmem:[%s8161_s3 + $0x8] sm:$0xff] }
 0xc0f   : > { %6770 = vpow2.f32 %v5208_v63  ;;  %v7894_v63 = vld [vmem:[%s8161_s3 + $0x10] sm:$0xff] }
 0xc10   : > { %6772 = vpow2.f32 %v5207_v1  ;;  %v7903_v1 = vld [vmem:[%s8161_s3 + $0x18] sm:$0xff] }
 0xc19   : > { %v6771_v5 = vpop.eup %6770 }
 0xc1a   : > { %v6773_v12 = vpop.eup %6772  ;;  %v3232_v21 = vadd.f32 1.0, %v6771_v5  ;;  %v7910_v5 = vld [vmem:[%s8161_s3 + $0x20] sm:$0xff] }
 0xc1b   : > { %v3231_v22 = vadd.f32 1.0, %v6773_v12  ;;  %v7926_v12 = vld [vmem:[%s8161_s3 + $0x30] sm:$0xff] }
 0xc1c   : > { %6774 = vrcp.f32 %v3232_v21  ;;  %v7940_v21 = vld [vmem:[%s8161_s3 + $0x40] sm:$0xff] }
 0xc1d   : > { %6776 = vrcp.f32 %v3231_v22  ;;  %v7947_v22 = vld [vmem:[%s8161_s3 + $0x48] sm:$0xff] }
 0xc26   : > { %v7793_v24 = vpop.eup %6774 }
 0xc27   : > { %v7795_v26 = vpop.eup %6776  ;;  %v3241_v4 = vmul.f32 %v7793_v24, %v7729_v41  ;;  %v5209_v41 = vld [vmem:[%s7337_s13 + $0x20] sm:$0xff]  ;;  %v3775_v46 = vsub.f32 1.0, %v7793_v24  ;;  %v3773_v7 = vmul.f32 %v7793_v24, %v7721_v33 }
 0xc28   : > { %v3240_v27 = vmul.f32 %v7795_v26, %v7734_v47  ;;  %v3774_v49 = vsub.f32 1.0, %v7795_v26  ;;  %v3772_v55 = vmul.f32 %v7795_v26, %v7723_v37 }
 0xc2a   : > { %v6440_v2 = vpack.c.bf16 %v3241_v4, %v3240_v27 }
 0xc2c   : > { %6441 = vmatprep.subr.bf16.mxu0 %v6440_v2 }
 0xc2d   : > { %6443 = vmatpush3.bf16.msra.mxu0 %v6440_v2 }
 0xc2e   : > { %6445 = vmatprep.subr.bf16.mxu0 %v7503_v25 }
 0xc30   : > { %6003 = vmatmul.mubr.msk.f32.vlgmr.msra.gmra.mrb[24].mxu0 %vm449_vm1, %v7377_v6 }
 0xc31   : > { %6005 = vmatprep.mubr.msk.f32.mxu0 %vm449_vm1, %v7382_v10  ;;  %6447 = vmatpush3.bf16.msra.mxu0 %v7503_v25 }
 0xc32   : > { %6449 = vmatprep.subr.bf16.mxu0 %v7506_v28 }
 0xc34   : > { %6006 = vmatmul.mubr.msk.f32.gmra.mrb[26].mxu0 %vm449_vm1, %v7396_v14 }
 0xc35   : > { %6008 = vmatprep.mubr.msk.f32.mxu0 %vm449_vm1, %v7402_v15  ;;  %6451 = vmatpush3.bf16.msra.mxu0 %v7506_v28 }
 0xc36   : > { %6453 = vmatprep.subr.bf16.mxu0 %v7529_v29 }
 0xc38   : > { %6009 = vmatmul.mubr.msk.f32.gmra.mrb[28].mxu0 %vm449_vm1, %v7412_v16 }
 0xc39   : > { %6011 = vmatprep.mubr.msk.f32.mxu0 %vm449_vm1, %v7418_v17 }
 0xc3c   : > { %6012 = vmatmul.mubr.msk.f32.gmra.mrb[30].mxu0 %vm449_vm1, %v7427_v18 }
 0xc3d   : > { %6014 = vmatprep.mubr.msk.f32.mxu0 %vm449_vm1, %v7432_v19 }
 0xc40   : > { %6015 = vmatmul.mubr.msk.f32.gmra.mrb[32].mxu0 %vm449_vm1, %v7441_v20 }
 0xd03   : > { %v6004_v6 = vpop.f32.mrb[24].mxu0 }
 0xd04   : > { %v3308_v10 = vpop.f32.mrb[25].mxu0 }
 0xd07   : > { %v6007_v14 = vpop.f32.mrb[26].mxu0 }
 0xd08   : > { %v3318_v15 = vpop.f32.mrb[27].mxu0 }
 0xd09   : > { %6025 = vmatprep.mubr.msk.f32.mxu0 %vm595_vm2, %v3318_v15 }
 0xd0a   : > { %6026 = vmatmul.mubr.msk.f32.vlgmr.msra.gmra.mrb[34].mxu0 %vm595_vm2, %v6007_v14 }
 0xd0b   : > { %6455 = vmatpush3.bf16.msra.mxu0 %v7529_v29  ;;  %6036 = vmatprep.mubr.msk.f32.mxu0 %vm595_vm2, %v3308_v10  ;;  %v6010_v16 = vpop.f32.mrb[28].mxu0 }
 0xd0c   : > { %6457 = vmatprep.subr.bf16.mxu0 %v7532_v38  ;;  %v3328_v17 = vpop.f32.mrb[29].mxu0 }
 0xd0f   : > { %6459 = vmatpush3.bf16.msra.mxu0 %v7532_v38  ;;  %v6013_v18 = vpop.f32.mrb[30].mxu0 }
 0xd10   : > { %6461 = vmatprep.subr.bf16.mxu0 %v7539_v43  ;;  %v3338_v19 = vpop.f32.mrb[31].mxu0 }
 0xd12   : > { %6037 = vmatmul.mubr.msk.f32.vlgmr.msra.gmra.mrb[34].mxu0 %vm595_vm2, %v6004_v6 }
 0xd13   : > { %6463 = vmatpush3.bf16.msra.mxu0 %v7539_v43  ;;  %6047 = vmatprep.mubr.msk.f32.mxu0 %vm595_vm2, %v3328_v17  ;;  %v6016_v20 = vpop.f32.mrb[32].mxu0 }
 0xd14   : > { %6465 = vmatprep.subr.bf16.mxu0 %v7543_v50  ;;  %v3348_v3 = vpop.f32.mrb[33].mxu0 }
 0xd17   : > { %6467 = vmatpush3.bf16.msra.mxu0 %v7543_v50 }
 0xd18   : > { %6469 = vmatprep.subr.bf16.mxu0 %v7549_v57 }
 0xd1a   : > { %6048 = vmatmul.mubr.msk.f32.vlgmr.msra.gmra.mrb[34].mxu0 %vm595_vm2, %v6010_v16 }
 0xd1b   : > { %6471 = vmatpush3.bf16.msra.mxu0 %v7549_v57  ;;  %6058 = vmatprep.mubr.msk.f32.mxu0 %vm595_vm2, %v3338_v19 }
 0xd1c   : > { %6473 = vmatprep.subr.bf16.mxu0 %v7553_v61 }
 0xd1f   : > { %6475 = vmatpush3.bf16.msra.mxu0 %v7553_v61 }
 0xd20   : > { %6477 = vmatprep.subr.bf16.mxu0 %v7559_v0 }
 0xd22   : > { %6059 = vmatmul.mubr.msk.f32.vlgmr.msra.gmra.mrb[34].mxu0 %vm595_vm2, %v6013_v18 }
 0xd23   : > { %6479 = vmatpush3.bf16.msra.mxu0 %v7559_v0  ;;  %6069 = vmatprep.mubr.msk.f32.mxu0 %vm595_vm2, %v3348_v3 }
 0xd24   : > { %6481 = vmatprep.subr.bf16.mxu0 %v7563_v9 }
 0xd27   : > { %6483 = vmatpush3.bf16.msra.mxu0 %v7563_v9 }
 0xd2a   : > { %6070 = vmatmul.mubr.msk.f32.vlgmr.msra.gmra.mrb[34].mxu0 %vm595_vm2, %v6016_v20 }
 0xd2b   : > { %6150 = vmatprep.mubr.msk.f32.mxu0 %vm449_vm1, %v6794_v31 }
 0xdfd   : > { %v6071_v47 = vpop.f32.mrb[34].mxu0 }
 0xdfe   : > { %v3769_v40 = vadd.f32 %v6071_v47, %v5210_v32  ;;  %v3757_v35 = vpop.f32.mrb[35].mxu0 }
 0xdff   : > { %v3768_v36 = vadd.f32 %v5209_v41, %v3757_v35 }
 0xe00   : > { %6778 = vtanh.f32 %v3769_v40 }
 0xe01   : > { %6780 = vtanh.f32 %v3768_v36 }
 0xe0a   : > { %v6779_v42 = vpop.eup %6778 }
 0xe0b   : > { %v6781_v45 = vpop.eup %6780  ;;  %3780 = vrot.lane.b32.xlu1 %v6779_v42, %s7038_s20 }
 0xe0c   : > { %3778 = vrot.lane.b32.xlu0 %v6781_v45, %s7038_s20 }
 0xe7d   : > { %v3781_v8 = vpop.permute.xlu1 %3780 }
 0xe7e   : > { %v3785_v52 = vmul.f32 %v3781_v8, %v3775_v46  ;;  %v3779_v53 = vpop.permute.xlu0 %3778 }
 0xe7f   : > { %v3784_v56 = vmul.f32 %v3779_v53, %v3774_v49 }
 0xe80   : > { %v7863_v58 = vadd.f32 %v3785_v52, %v3773_v7 }
 0xe81   : > { %v7865_v59 = vadd.f32 %v3784_v56, %v3772_v55 }
 0xe82   : > { %3792 = vrot.lane.b32.xlu1 %v7863_v58, %s7039_s18 }
 0xe83   : > { %3790 = vrot.lane.b32.xlu0 %v7865_v59, %s7039_s18 }
 0xef4   : > { %v7871_v60 = vpop.permute.xlu1 %3792 }
 0xef5   : > { %5232 = vst.msk [vmem:[%s7356_s17 + $0x28] sm:$0xff] %vm595_vm2, %v7871_v60  ;;  %v7876_v33 = vpop.permute.xlu0 %3790 }
 0xef6   : > { %5231 = vst.msk [vmem:[%s7356_s17 + $0x20] sm:$0xff] %vm595_vm2, %v7876_v33  ;;  %v6484_v37 = vpack.c.bf16 %v7871_v60, %v7876_v33 }
 0xef8   : > { %6485 = vmatprep.subr.bf16.mxu1 %v6484_v37 }
 0xef9   : > { %6487 = vmatpush3.bf16.msra.mxu1 %v6484_v37 }
 0xefa   : > { %6489 = vmatprep.subr.bf16.mxu1 %v7384_v11 }
 0xefc   : > { %6077 = vmatmul.mubr.msk.f32.vlgmr.msra.gmra.mrb[36].mxu1 %vm449_vm1, %v7887_v62 }
 0xefd   : > { %6079 = vmatprep.mubr.msk.f32.mxu1 %vm449_vm1, %v7894_v63  ;;  %6491 = vmatpush3.bf16.msra.mxu1 %v7384_v11  ;;  %v7919_v11 = vld [vmem:[%s8161_s3 + $0x28] sm:$0xff] }
 0xefe   : > { %6493 = vmatprep.subr.bf16.mxu1 %v7386_v13 }
 0xf00   : > { %6080 = vmatmul.mubr.msk.f32.gmra.mrb[38].mxu1 %vm449_vm1, %v7903_v1 }
 0xf01   : > { %6082 = vmatprep.mubr.msk.f32.mxu1 %vm449_vm1, %v7910_v5  ;;  %6495 = vmatpush3.bf16.msra.mxu1 %v7386_v13  ;;  %v7933_v13 = vld [vmem:[%s8161_s3 + $0x38] sm:$0xff] }
 0xf02   : > { %6497 = vmatprep.subr.bf16.mxu1 %v7445_v23 }
 0xf04   : > { %6083 = vmatmul.mubr.msk.f32.gmra.mrb[40].mxu1 %vm449_vm1, %v7919_v11 }
 0xf05   : > { %6085 = vmatprep.mubr.msk.f32.mxu1 %vm449_vm1, %v7926_v12 }
 0xf08   : > { %6086 = vmatmul.mubr.msk.f32.gmra.mrb[42].mxu1 %vm449_vm1, %v7933_v13 }
 0xf09   : > { %6088 = vmatprep.mubr.msk.f32.mxu1 %vm449_vm1, %v7940_v21 }
 0xf0c   : > { %6089 = vmatmul.mubr.msk.f32.gmra.mrb[44].mxu1 %vm449_vm1, %v7947_v22 }
 0xfcf   : > { %v6078_v24 = vpop.f32.mrb[36].mxu1 }
 0xfd0   : > { %v3868_v26 = vpop.f32.mrb[37].mxu1 }
 0xfd3   : > { %v6081_v4 = vpop.f32.mrb[38].mxu1 }
 0xfd4   : > { %v3878_v27 = vpop.f32.mrb[39].mxu1 }
 0xfd5   : > { %6099 = vmatprep.mubr.msk.f32.mxu1 %vm595_vm2, %v3878_v27 }
 0xfd6   : > { %6100 = vmatmul.mubr.msk.f32.vlgmr.msra.gmra.mrb[46].mxu1 %vm595_vm2, %v6081_v4 }
 0xfd7   : > { %6499 = vmatpush3.bf16.msra.mxu1 %v7445_v23  ;;  %6110 = vmatprep.mubr.msk.f32.mxu1 %vm595_vm2, %v3868_v26  ;;  %v6084_v2 = vpop.f32.mrb[40].mxu1 }
 0xfd8   : > { %6501 = vmatprep.subr.bf16.mxu1 %v7452_v30  ;;  %v3888_v6 = vpop.f32.mrb[41].mxu1 }
 0xfdb   : > { %6503 = vmatpush3.bf16.msra.mxu1 %v7452_v30  ;;  %v6087_v10 = vpop.f32.mrb[42].mxu1  ;;  %v5234_v30 = vld [vmem:[%s7330_s30 + $0x38] sm:$0xff] }
 0xfdc   : > { %6505 = vmatprep.subr.bf16.mxu1 %v7459_v34  ;;  %v3898_v14 = vpop.f32.mrb[43].mxu1 }
 0xfde   : > { %6111 = vmatmul.mubr.msk.f32.vlgmr.msra.gmra.mrb[46].mxu1 %vm595_vm2, %v6078_v24 }
 0xfdf   : > { %6507 = vmatpush3.bf16.msra.mxu1 %v7459_v34  ;;  %6121 = vmatprep.mubr.msk.f32.mxu1 %vm595_vm2, %v3888_v6  ;;  %v6090_v15 = vpop.f32.mrb[44].mxu1  ;;  %v5233_v34 = vld [vmem:[%s7330_s30 + $0x30] sm:$0xff]  ;;  %s5291_s30 = sshll.u32 %s7014_s24, 3  ;;  %s4907_s24 = scalar_lea.sflag [#allocation5], %s7326_s15 }
 0xfe0   : > { %6509 = vmatprep.subr.bf16.mxu1 %v7463_v39  ;;  %v3908_v23 = vpop.f32.mrb[45].mxu1 }
 0xfe3   : > { %6511 = vmatpush3.bf16.msra.mxu1 %v7463_v39 }
 0xfe4   : > { %6513 = vmatprep.subr.bf16.mxu1 %v7469_v44 }
 0xfe6   : > { %6122 = vmatmul.mubr.msk.f32.vlgmr.msra.gmra.mrb[46].mxu1 %vm595_vm2, %v6084_v2 }
 0xfe7   : > { %6515 = vmatpush3.bf16.msra.mxu1 %v7469_v44  ;;  %6132 = vmatprep.mubr.msk.f32.mxu1 %vm595_vm2, %v3898_v14 }
 0xfe8   : > { %6517 = vmatprep.subr.bf16.mxu1 %v7473_v48 }
 0xfeb   : > { %6519 = vmatpush3.bf16.msra.mxu1 %v7473_v48 }
 0xfec   : > { %6521 = vmatprep.subr.bf16.mxu1 %v7479_v51 }
 0xfee   : > { %6133 = vmatmul.mubr.msk.f32.vlgmr.msra.gmra.mrb[46].mxu1 %vm595_vm2, %v6087_v10 }
 0xfef   : > { %6523 = vmatpush3.bf16.msra.mxu1 %v7479_v51  ;;  %6143 = vmatprep.mubr.msk.f32.mxu1 %vm595_vm2, %v3908_v23 }
 0xff0   : > { %6525 = vmatprep.subr.bf16.mxu1 %v7483_v54 }
 0xff3   : > { %6527 = vmatpush3.bf16.msra.mxu1 %v7483_v54 }
 0xff6   : > { %6144 = vmatmul.mubr.msk.f32.vlgmr.msra.gmra.mrb[46].mxu1 %vm595_vm2, %v6090_v15 }
0x10c9   : > { %v6145_v39 = vpop.f32.mrb[46].mxu1 }
0x10ca   : > { %v4329_v44 = vadd.f32 %v6145_v39, %v5234_v30  ;;  %v4317_v16 = vpop.f32.mrb[47].mxu1 }
0x10cb   : > { %v4328_v48 = vadd.f32 %v5233_v34, %v4317_v16 }
0x10cc   : > { %v5256_v17 = vmul.f32 -1.442695, %v4329_v44 }
0x10cd   : > { %v5255_v18 = vmul.f32 -1.442695, %v4328_v48 }
0x10ce   : > { %6782 = vpow2.f32 %v5256_v17 }
0x10cf   : > { %6784 = vpow2.f32 %v5255_v18 }
0x10d8   : > { %v6783_v19 = vpop.eup %6782 }
0x10d9   : > { %v6785_v51 = vpop.eup %6784  ;;  %v4337_v20 = vadd.f32 1.0, %v6783_v19 }
0x10da   : > { %v4336_v3 = vadd.f32 1.0, %v6785_v51 }
0x10db   : > { %6786 = vrcp.f32 %v4337_v20 }
0x10dc   : > { %6788 = vrcp.f32 %v4336_v3 }
0x10e5   : > { %v7978_v31 = vpop.eup %6786 }
0x10e6   : > { %v7980_v54 = vpop.eup %6788  ;;  %v4346_v32 = vmul.f32 %v7978_v31, %v7871_v60  ;;  %v4878_v55 = vmul.f32 %v7978_v31, %v7863_v58 }
0x10e7   : > { %v4345_v41 = vmul.f32 %v7980_v54, %v7876_v33  ;;  %v4879_v53 = vsub.f32 1.0, %v7980_v54  ;;  %v4877_v33 = vmul.f32 %v7980_v54, %v7865_v59 }
0x10e9   : > { %v6528_v47 = vpack.c.bf16 %v4346_v32, %v4345_v41 }
0x10eb   : > { %6529 = vmatprep.subr.bf16.mxu0 %v6528_v47 }
0x10ec   : > { %6531 = vmatpush3.bf16.msra.mxu0 %v6528_v47 }
0x10ed   : > { %6533 = vmatprep.subr.bf16.mxu0 %v7503_v25 }
0x10ef   : > { %6151 = vmatmul.mubr.msk.f32.vlgmr.msra.gmra.mrb[36].mxu0 %vm449_vm1, %v7887_v62 }
0x10f0   : > { %6153 = vmatprep.mubr.msk.f32.mxu0 %vm449_vm1, %v7894_v63  ;;  %6535 = vmatpush3.bf16.msra.mxu0 %v7503_v25 }
0x10f1   : > { %6537 = vmatprep.subr.bf16.mxu0 %v7506_v28 }
0x10f3   : > { %6154 = vmatmul.mubr.msk.f32.gmra.mrb[38].mxu0 %vm449_vm1, %v7903_v1 }
0x10f4   : > { %6156 = vmatprep.mubr.msk.f32.mxu0 %vm449_vm1, %v7910_v5  ;;  %6539 = vmatpush3.bf16.msra.mxu0 %v7506_v28 }
0x10f5   : > { %6541 = vmatprep.subr.bf16.mxu0 %v7529_v29 }
0x10f7   : > { %6157 = vmatmul.mubr.msk.f32.gmra.mrb[40].mxu0 %vm449_vm1, %v7919_v11 }
0x10f8   : > { %6159 = vmatprep.mubr.msk.f32.mxu0 %vm449_vm1, %v7926_v12 }
0x10fb   : > { %6160 = vmatmul.mubr.msk.f32.gmra.mrb[42].mxu0 %vm449_vm1, %v7933_v13 }
0x10fc   : > { %6162 = vmatprep.mubr.msk.f32.mxu0 %vm449_vm1, %v7940_v21 }
0x10ff   : > { %6163 = vmatmul.mubr.msk.f32.gmra.mrb[44].mxu0 %vm449_vm1, %v7947_v22 }
0x11c2   : > { %v6152_v25 = vpop.f32.mrb[36].mxu0 }
0x11c3   : > { %v4413_v40 = vpop.f32.mrb[37].mxu0 }
0x11c6   : > { %v6155_v28 = vpop.f32.mrb[38].mxu0 }
0x11c7   : > { %v4423_v35 = vpop.f32.mrb[39].mxu0 }
0x11c8   : > { %6173 = vmatprep.mubr.msk.f32.mxu0 %vm595_vm2, %v4423_v35 }
0x11c9   : > { %6174 = vmatmul.mubr.msk.f32.vlgmr.msra.gmra.mrb[46].mxu0 %vm595_vm2, %v6155_v28 }
0x11ca   : > { %6543 = vmatpush3.bf16.msra.mxu0 %v7529_v29  ;;  %6184 = vmatprep.mubr.msk.f32.mxu0 %vm595_vm2, %v4413_v40  ;;  %v6158_v36 = vpop.f32.mrb[40].mxu0 }
0x11cb   : > { %6545 = vmatprep.subr.bf16.mxu0 %v7532_v38  ;;  %v4433_v42 = vpop.f32.mrb[41].mxu0 }
0x11ce   : > { %6547 = vmatpush3.bf16.msra.mxu0 %v7532_v38  ;;  %v6161_v45 = vpop.f32.mrb[42].mxu0  ;;  %v5258_v38 = vld [vmem:[%s7337_s13 + $0x38] sm:$0xff] }
0x11cf   : > { %6549 = vmatprep.subr.bf16.mxu0 %v7539_v43  ;;  %v4443_v46 = vpop.f32.mrb[43].mxu0 }
0x11d1   : > { %6185 = vmatmul.mubr.msk.f32.vlgmr.msra.gmra.mrb[46].mxu0 %vm595_vm2, %v6152_v25 }
0x11d2   : > { %6551 = vmatpush3.bf16.msra.mxu0 %v7539_v43  ;;  %6195 = vmatprep.mubr.msk.f32.mxu0 %vm595_vm2, %v4433_v42  ;;  %v6164_v8 = vpop.f32.mrb[44].mxu0  ;;  %v5257_v43 = vld [vmem:[%s7337_s13 + $0x30] sm:$0xff] }
0x11d3   : > { %6553 = vmatprep.subr.bf16.mxu0 %v7543_v50  ;;  %v4453_v29 = vpop.f32.mrb[45].mxu0 }
0x11d6   : > { %6555 = vmatpush3.bf16.msra.mxu0 %v7543_v50 }
0x11d7   : > { %6557 = vmatprep.subr.bf16.mxu0 %v7549_v57 }
0x11d9   : > { %6196 = vmatmul.mubr.msk.f32.vlgmr.msra.gmra.mrb[46].mxu0 %vm595_vm2, %v6158_v36 }
0x11da   : > { %6559 = vmatpush3.bf16.msra.mxu0 %v7549_v57  ;;  %6206 = vmatprep.mubr.msk.f32.mxu0 %vm595_vm2, %v4443_v46 }
0x11db   : > { %6561 = vmatprep.subr.bf16.mxu0 %v7553_v61 }
0x11de   : > { %6563 = vmatpush3.bf16.msra.mxu0 %v7553_v61 }
0x11df   : > { %6565 = vmatprep.subr.bf16.mxu0 %v7559_v0 }
0x11e1   : > { %6207 = vmatmul.mubr.msk.f32.vlgmr.msra.gmra.mrb[46].mxu0 %vm595_vm2, %v6161_v45 }
0x11e2   : > { %6567 = vmatpush3.bf16.msra.mxu0 %v7559_v0  ;;  %6217 = vmatprep.mubr.msk.f32.mxu0 %vm595_vm2, %v4453_v29  ;;  %v4880_v0 = vsub.f32 1.0, %v7978_v31 }
0x11e3   : > { %6569 = vmatprep.subr.bf16.mxu0 %v7563_v9 }
0x11e6   : > { %6571 = vmatpush3.bf16.msra.mxu0 %v7563_v9 }
0x11e9   : > { %6218 = vmatmul.mubr.msk.f32.vlgmr.msra.gmra.mrb[46].mxu0 %vm595_vm2, %v6164_v8 }
0x12bc   : > { %v6219_v50 = vpop.f32.mrb[46].mxu0 }
0x12bd   : > { %v4874_v57 = vadd.f32 %v6219_v50, %v5258_v38  ;;  %v4862_v49 = vpop.f32.mrb[47].mxu0 }
0x12be   : > { %v4873_v61 = vadd.f32 %v5257_v43, %v4862_v49 }
0x12bf   : > { %6790 = vtanh.f32 %v4874_v57 }
0x12c0   : > { %6792 = vtanh.f32 %v4873_v61 }
0x12c9   : > { %v6791_v7 = vpop.eup %6790 }
0x12ca   : > { %v6793_v52 = vpop.eup %6792  ;;  %4885 = vrot.lane.b32.xlu1 %v6791_v7, %s7038_s20 }
0x12cb   : > { %4883 = vrot.lane.b32.xlu0 %v6793_v52, %s7038_s20  ;;  %s5284_s20 = sshll.u32 %s7018_s25, 4  ;;  %s6920_s25 = scalar_lea.vmem %s8054_s21, 1024 }
0x12cc   : > { %s4920_s4 = sadd.s32 %s5291_s30, %s5284_s20  ;;  %p6921_p9 = scmp.ne.s32.totalorder %s8054_s21, %s6920_s25 }
0x12cd   : > { %s5285_s19 = sshll.u32 %s4920_s4, 7 }
0x12ce   : > { %s8052_s10 = scalar_lea.hbm %s8163_s14, %s5285_s19  ;;  %p6922_p4 = pnand %p6921_p9, %p7222_p8 }
0x12d0   : > { %p6923_p6 = pneg %p6922_p4 }
0x133c   : > { %v4886_v9 = vpop.permute.xlu1 %4885 }
0x133d   : > { %v4890_v56 = vmul.f32 %v4886_v9, %v4880_v0  ;;  %v4884_v60 = vpop.permute.xlu0 %4883 }
0x133e   : > { %v4889_v37 = vmul.f32 %v4884_v60, %v4879_v53 }
0x133f   : > { %v4892_v62 = vadd.f32 %v4890_v56, %v4878_v55 }
0x1340   : > { %v4891_v63 = vadd.f32 %v4889_v37, %v4877_v33 }
0x1341   : > { %4897 = vrot.lane.b32.xlu1 %v4892_v62, %s7039_s18 }
0x1342   : > { %4895 = vrot.lane.b32.xlu0 %v4891_v63, %s7039_s18  ;;  %s7040_s18 = smov [#allocation11]  }
0x1343   : > { %s6924_s11 = sshll.u32 %s7040_s18, 4  ;;  %s6925_s11 = int_to_ptr.vmem [resolvable:$false] %s6924_s11 }
0x1344   : > { %s6926_s7 = scalar_lea.vmem %s6925_s11, 2048  ;;  %p6927_p11 = scmp.lt.s32.totalorder %s8054_s21, %s6925_s11 }
0x1345   : > { %p6928_p13 = scmp.lt.s32.totalorder %s6926_s7, %s6920_s25 }
0x1347   : > { %p6929_p5 = por %p6928_p13, %p6927_p11 }
0x1349   : > { %p6930_p10 = pnand %p6929_p5, %p6923_p6 }
0x13b3   : > { %v4898_v58 = vpop.permute.xlu1 %4897 }
0x13b4   : > { %5280 = vst.msk [vmem:[%s7356_s17 + $0x38] sm:$0xff] %vm595_vm2, %v4898_v58  ;;  %4905 = vst.msk [vmem:[#allocation2 + $0x8] sm:$0xff] %vm595_vm2, %v4898_v58  ;;  %v4896_v59 = vpop.permute.xlu0 %4895 }
0x13b5   : > { %5279 = vst.msk [vmem:[%s7356_s17 + $0x30] sm:$0xff] %vm595_vm2, %v4896_v59  ;;  %4904 = vst.msk [vmem:[#allocation2] sm:$0xff] %vm595_vm2, %v4896_v59 }
0x13b6   : > { %6933 = shalt.err (!%p6930_p10)
}
0x13b7   : > { %s6934_s17 = scalar_lea.hbm %s8052_s10, 1024  ;;  %s6938_s6 = scalar_lea.hbm %s8163_s14, 4096 }
0x13b8   : > { %p6935_p0 = scmp.ne.s32.totalorder %s8052_s10, %s6934_s17  ;;  %p6939_p12 = scmp.lt.u32.totalorder %s8052_s10, %s8163_s14 }
0x13b9   : > { %p6940_p1 = scmp.lt.u32.totalorder %s6938_s6, %s6934_s17  ;;  %p6942_p9 = scmp.lt.u32.totalorder %s6934_s17, %s8052_s10 }
0x13ba   : > { %p6936_p3 = pnand %p6935_p0, %p7222_p8 }
0x13bb   : > { %p6941_p2 = por %p6940_p1, %p6939_p12 }
0x13bc   : > { %p6937_p7 = pneg %p6936_p3 }
0x13bd   : > { %p6943_p4 = por %p6942_p9, %p6941_p2 }
0x13bf   : > { %p6944_p6 = pnand %p6943_p4, %p6937_p7 }
0x13c1   : > { %6947 = shalt.err (!%p6944_p6)
}
0x13c2   : > { %s7041_s4 = smov 128   ;;  %s7042_s19 = smov 8  }
0x13c3   : > { %6648 = dma.vmem_to_hbm [thread:$0]  (%p7222_p8), %s8054_s21, 1024, %s8052_s10, %s4907_s24, %s7041_s4, %s7041_s4, %s7042_s19  }
0x13c4 PF: > { %s8164_s12 = sld [smem:[#allocation17_spill]]  ;;  %s8165_s9 = sld [smem:[#allocation18_spill]] }
0x13c5   : > { %p6673_p11 = scmp.ge.s32.totalorder %s7030_s28, 2 }
0x13ca   : > { %s4938_s25 = sand.u32 1, %s8164_s12   ;;  %p8166_p13 = scmp.ne.s32.totalorder %s8165_s9, 0 }
0x13cb   : > { %s4939_s18 = scalar_lea.sflag [#allocation5], %s4938_s25 }
0x13cc   : > { %p6665_p5 = pnand %p6673_p11, %p8166_p13 }
0x13ce   : > { %6997 = dma.done.wait (!%p6665_p5), %s4939_s18, 1024  }
0x13cf   : > { %6999 = vsyncadd (!%p6665_p5), %s4939_s18, 4294966272  ;;  %s26_s28 = sadd.s32 1, %s7030_s28   ;;  %s8167_s15 = sld [smem:[#allocation19_spill]] }
0x13d0   : > { %p23_p10 = scmp.ge.s32.totalorder %s26_s28, 6   ;;  %s8168_s21 = smov %s7006_s22 }
0x13d1   : > { %s8169_s22 = smov %s7010_s23  ;;  %s8170_s23 = smov %s7235_s5 }
0x13d2   : > { %s8171_s24 = smov %s7022_s26  ;;  %s8172_s25 = smov %s7026_s27 }
0x13d3   : > { %s8174_s27 = smov %s8180_s16  ;;  %25 = sbr.rel (!%p23_p10) target bundleno = 15 (0xf), region = 126 }
0x13d5   : > { %s8173_s26 = smov %s8167_s15 }
0x13da   :  { %4944 = vsyncpa [#allocation4], 1 }
0x13db   :  { %4946 = vsyncpa [#allocation4 + $0x1], 1 }
0x13dc   :  { %4947 = vsyncpa [#allocation7], 1 }
0x13dd   :  { %4949 = vsyncpa [#allocation7 + $0x1], 1 }
0x13de   :  { %4950 = vsyncpa [#allocation10], 1 }
0x13df   :  { %4951 = vsyncpa [#allocation5], 1 }
0x13e0   :  { %4953 = vsyncpa [#allocation5 + $0x1], 1 }

</bundles_post_ra>
